<compile_context>
chip_gen: v7x
topology: tpu7x:2x2x1
jax: 0.10.0
libtpu: 0.0.40
codegen_flags: <defaults>
</compile_context>

<pallas_src>
import functools

import jax
import jax.numpy as jnp
from jax.experimental import pallas as pl
from jax.experimental.pallas import tpu as pltpu


def _round_up(a: int, m: int) -> int:
    return ((a + m - 1) // m) * m


def _vmem_capacity_bytes() -> int:
    """Per-core VMEM capacity; conservative 64 MiB (v7x) fallback."""
    try:
        cap = int(pltpu.get_tpu_info().vmem_capacity_bytes)
        if cap > 0:
            return cap
    except Exception:
        pass
    return 64 * 1024 * 1024


def _spiking_mlp_kernel(x_ref, w1_ref, b1_ref, w2_ref, b2_ref, o_ref, s1_ref,
                        *, T, t_chunk, tau, v_th):
    inv_tau = 1.0 / tau
    decay = 1.0 - inv_tau          # LIF charge: h = v*(1 - 1/tau) + pre/tau

    x = x_ref[...]                  # (tile_n, C)     mxu dtype
    w1 = w1_ref[...]                # (C, H_pad)      mxu dtype
    w2 = w2_ref[...]                # (H_pad, o_pad)  mxu dtype
    b1 = b1_ref[...]                # (1, H_pad)      f32
    b2 = b2_ref[...]                # (1, o_pad)      f32

    tile_n = x.shape[0]
    o_pad = w2.shape[1]
    spike_dtype = s1_ref.dtype      # 0/1 spikes are exact in bf16

    # fc1 pre-activation is identical for all T timesteps (input repeated),
    # so compute it once; f32 accumulation on the MXU.  Fold the 1/tau scale
    # so the per-timestep LIF update is just mul+add.
    pre1_s = (jnp.dot(x, w1, preferred_element_type=jnp.float32) + b1) * inv_tau

    # ---- LIF1 recurrence (pure VPU) ----
    # Spikes go straight into the VMEM scratch slab so the T fc2 matmuls can
    # be batched without a concatenate / extra VMEM copy, and vreg live
    # ranges stay bounded to (v1, one spike tile).
    v1 = jnp.zeros_like(pre1_s)
    for t in range(T):
        h1 = v1 * decay + pre1_s
        fired1 = h1 >= v_th
        s1_ref[t * tile_n:(t + 1) * tile_n, :] = fired1.astype(spike_dtype)
        v1 = jnp.where(fired1, 0.0, h1)          # hard reset to v_reset = 0

    # ---- batched fc2 (chunked along T) + LIF2 recurrence + mean over T ----
    v2 = jnp.zeros((tile_n, o_pad), jnp.float32)
    acc = jnp.zeros((tile_n, o_pad), jnp.float32)
    for c0 in range(0, T, t_chunk):
        cs = min(t_chunk, T - c0)
        s1_chunk = s1_ref[c0 * tile_n:(c0 + cs) * tile_n, :]
        pre2_s = (jnp.dot(s1_chunk, w2, preferred_element_type=jnp.float32)
                  + b2) * inv_tau
        for t in range(cs):
            p = pre2_s[t * tile_n:(t + 1) * tile_n]     # static, aligned slice
            h2 = v2 * decay + p
            fired2 = h2 >= v_th
            acc = acc + fired2.astype(jnp.float32)
            v2 = jnp.where(fired2, 0.0, h2)

    # Mean over time.  o_ref may be bf16 (exact when T is a power of two).
    o_ref[...] = (acc * (1.0 / T)).astype(o_ref.dtype)


def spiking_mlp(x, w1, b1, w2, b2, *, T=4, tau=2.0, v_th=1.0,
                tile_n=None, mxu_dtype=jnp.bfloat16):
    """x: (B, S, C).  w1: (C, H), b1: (H,), w2: (H, O), b2: (O,).

    Weights are stored (in_features, out_features), i.e. the transpose of
    PyTorch's nn.Linear weight, so the kernel matmul is a plain rows @ W.
    """
    B, S, C = x.shape
    H = w1.shape[1]
    O = w2.shape[1]
    n = B * S
    T = int(T)

    # Lane-dense hidden / output: pad to multiples of 128 with zero columns /
    # rows.  Padded neurons have pre1 == 0 so they never fire -> exact.
    H_pad = _round_up(H, 128)
    o_pad = _round_up(O, 128)

    mxu_itemsize = jnp.dtype(mxu_dtype).itemsize

    # Output can be stored in bf16 exactly when T is a power of two: the mean
    # is k/T with integer k <= T, exact in bf16 for T <= 256.
    t_pow2 = T > 0 and (T & (T - 1)) == 0 and T <= 256
    out_store_dtype = jnp.bfloat16 if t_pow2 else jnp.float32
    out_itemsize = jnp.dtype(out_store_dtype).itemsize

    capacity = _vmem_capacity_bytes()
    budget = int(0.70 * capacity)                 # leave compiler headroom

    # Default row tile from VMEM capacity class (bigger on 128 MiB parts).
    if tile_n is None:
        tile_n = 2048 if capacity >= (100 << 20) else 1024

    # Guarantee >= 2 grid programs so dimension_semantics=("parallel",)
    # actually shards rows across both TensorCores on v7x; costs at most one
    # extra ~0.35us grid step on single-TC parts.
    if n > 8:
        tile_n = min(tile_n, _round_up(-(-n // 2), 8))
    tile_n = _round_up(max(8, min(int(tile_n), _round_up(n, 8))), 8)

    def pick_t_chunk(tn):
        # Bound the f32 pre2 chunk (largest live intermediate).
        cap = max(tn * o_pad * 4, min(8 << 20, budget // 6))
        tc = T
        while tc > 1 and tc * tn * o_pad * 4 > cap:
            tc = (tc + 1) // 2
        return tc

    def est(tn):
        # Conservative: weights counted double-buffered even when the
        # Buffered(1) spec is accepted, so both compile paths fit.
        tc = pick_t_chunk(tn)
        return (2 * tn * C * mxu_itemsize                     # x tile (x2 buf)
                + 2 * tn * o_pad * out_itemsize               # out tile (x2 buf)
                + 2 * (C * H_pad + H_pad * o_pad) * mxu_itemsize   # weights
                + 2 * (H_pad + o_pad) * 4                     # biases
                + T * tn * H_pad * mxu_itemsize               # spike scratch slab
                + 2 * tn * H_pad * 4                          # pre1_s + v1
                + tc * tn * o_pad * 4                         # pre2 chunk
                + 3 * tn * o_pad * 4)                         # v2 / acc / staging

    while tile_n > 8 and est(tile_n) > budget:
        tile_n = _round_up(max(8, tile_n // 2), 8)

    t_chunk = pick_t_chunk(tile_n)
    n_pad = _round_up(n, tile_n)
    vmem_limit = int(min(max(est(tile_n) + (8 << 20), 16 << 20),
                         capacity - (4 << 20)))

    # Cast x to the MXU dtype first, then pad (no intermediate f32 HBM copy).
    x2 = x.reshape(n, C).astype(mxu_dtype)
    if n_pad != n:
        x2 = jnp.pad(x2, ((0, n_pad - n), (0, 0)))

    w1c = jnp.pad(w1.astype(mxu_dtype), ((0, 0), (0, H_pad - H)))
    b1c = jnp.pad(b1.astype(jnp.float32), (0, H_pad - H)).reshape(1, H_pad)
    w2c = jnp.pad(w2.astype(mxu_dtype), ((0, H_pad - H), (0, o_pad - O)))
    b2c = jnp.pad(b2.astype(jnp.float32), (0, o_pad - O)).reshape(1, o_pad)

    kernel = functools.partial(_spiking_mlp_kernel, T=T, t_chunk=int(t_chunk),
                               tau=float(tau), v_th=float(v_th))

    # TODO(synk): for very wide fc2 (H_pad*o_pad weights not VMEM-resident on
    # v7x), add a second grid axis over output-column tiles and recompute the
    # spike slab only under pl.when(pl.program_id(1) == 0).

    def make_call(single_buffer_weights):
        wk = ({"pipeline_mode": pl.Buffered(1)}
              if single_buffer_weights else {})
        in_specs = [
            pl.BlockSpec((tile_n, C), lambda i: (i, 0)),            # x row tile
            pl.BlockSpec((C, H_pad), lambda i: (0, 0), **wk),       # w1 (resident)
            pl.BlockSpec((1, H_pad), lambda i: (0, 0), **wk),       # b1 (resident)
            pl.BlockSpec((H_pad, o_pad), lambda i: (0, 0), **wk),   # w2 (resident)
            pl.BlockSpec((1, o_pad), lambda i: (0, 0), **wk),       # b2 (resident)
        ]
        return pl.pallas_call(
            kernel,
            out_shape=jax.ShapeDtypeStruct((n_pad, o_pad), out_store_dtype),
            grid=(n_pad // tile_n,),
            in_specs=in_specs,
            out_specs=pl.BlockSpec((tile_n, o_pad), lambda i: (i, 0)),
            scratch_shapes=[pltpu.VMEM((T * tile_n, H_pad), mxu_dtype)],
            compiler_params=pltpu.CompilerParams(
                dimension_semantics=("parallel",),
                vmem_limit_bytes=vmem_limit),
        )

    args = (x2, w1c, b1c, w2c, b2c)
    try:
        out = jax.block_until_ready(make_call(True)(*args))
    except Exception:
        # Fallback if this jax version rejects single-buffered BlockSpecs;
        # default (double-buffered) weights are correct, just use more VMEM.
        out = make_call(False)(*args)

    return out[:n, :O].astype(jnp.float32).reshape(B, S, O)


def _reference(x, w1, b1, w2, b2, *, T=4, tau=2.0, v_th=1.0,
               mxu_dtype=jnp.float32):
    """Pure-JAX reference matching the PyTorch/spikingjelly forward.

    Uses h = v*(1 - 1/tau) + pre/tau, algebraically identical to the
    spikingjelly charge v + (x - v)/tau with v_reset = 0.  `mxu_dtype`
    mirrors the kernel's matmul input dtype so the bf16 fast path can be
    checked apples-to-apples (spikes are exact 0/1 in bf16).
    """
    B, S, C = x.shape
    n = B * S
    O = w2.shape[1]
    inv_tau = 1.0 / tau
    decay = 1.0 - inv_tau

    x2 = x.reshape(n, C).astype(mxu_dtype)
    w1c = w1.astype(mxu_dtype)
    w2c = w2.astype(mxu_dtype)
    b1f = b1.astype(jnp.float32)[None, :]
    b2f = b2.astype(jnp.float32)[None, :]

    pre1_s = (jnp.dot(x2, w1c, preferred_element_type=jnp.float32) + b1f) * inv_tau
    v1 = jnp.zeros_like(pre1_s)
    v2 = jnp.zeros((n, O), jnp.float32)
    acc = jnp.zeros((n, O), jnp.float32)
    for _ in range(T):
        h1 = v1 * decay + pre1_s
        s1 = h1 >= v_th
        v1 = jnp.where(s1, 0.0, h1)
        pre2_s = (jnp.dot(s1.astype(mxu_dtype), w2c,
                          preferred_element_type=jnp.float32) + b2f) * inv_tau
        h2 = v2 * decay + pre2_s
        s2 = h2 >= v_th
        acc = acc + s2.astype(jnp.float32)
        v2 = jnp.where(s2, 0.0, h2)
    return (acc / T).reshape(B, S, O)


if __name__ == "__main__":
    # Small shapes consistent with the module's forward: x is (B, S, C).
    B, S, C, H, O, T = 2, 8, 32, 64, 32, 4

    key = jax.random.PRNGKey(0)
    kx, kw1, kb1, kw2, kb2 = jax.random.split(key, 5)

    x = jax.random.normal(kx, (B, S, C), dtype=jnp.float32)

    # Deterministic nn.Linear-style init: U(-1/sqrt(fan_in), 1/sqrt(fan_in)).
    lim1 = 1.0 / (float(C) ** 0.5)
    lim2 = 1.0 / (float(H) ** 0.5)
    w1 = jax.random.uniform(kw1, (C, H), jnp.float32, -lim1, lim1)   # (in, out)
    b1 = jax.random.uniform(kb1, (H,), jnp.float32, -lim1, lim1)
    w2 = jax.random.uniform(kw2, (H, O), jnp.float32, -lim2, lim2)   # (in, out)
    b2 = jax.random.uniform(kb2, (O,), jnp.float32, -lim2, lim2)

    # Exact original-module semantics: f32 MXU path (validation only).
    out_f32 = jax.block_until_ready(
        spiking_mlp(x, w1, b1, w2, b2, T=T, mxu_dtype=jnp.float32))
    ref_f32 = _reference(x, w1, b1, w2, b2, T=T, mxu_dtype=jnp.float32)
    assert out_f32.shape == (B, S, O)
    assert jnp.allclose(out_f32, ref_f32, atol=1e-5, rtol=1e-5)

    # bf16-MXU fast path (recommended on v5e/v6e/v7x).  Spikes are exact 0/1
    # in bf16; only weight rounding differs.  NOTE: because the LIF threshold
    # (h >= v_th) is a hard compare, bf16 weight rounding can flip
    # near-threshold spikes vs. the exact-f32 module -- a behavioral, not
    # just rounding-level, approximation; compared against a bf16-rounded
    # reference here.
    out_bf16 = jax.block_until_ready(
        spiking_mlp(x, w1, b1, w2, b2, T=T, mxu_dtype=jnp.bfloat16))
    ref_bf16 = _reference(x, w1, b1, w2, b2, T=T, mxu_dtype=jnp.bfloat16)
    assert out_bf16.shape == (B, S, O)
    assert jnp.allclose(out_bf16, ref_bf16, atol=1e-5, rtol=1e-5)

    print("KERNEL_OK")
</pallas_src>

<mosaic_0001>
module attributes {stable_mosaic.version = 11 : i64} {
  func.func @_spiking_mlp_kernel(%arg0: i32, %arg1: memref<8x32xf32, #tpu.memory_space<vmem>>, %arg2: memref<32x128xf32, #tpu.memory_space<vmem>>, %arg3: memref<1x128xf32, #tpu.memory_space<vmem>>, %arg4: memref<128x128xf32, #tpu.memory_space<vmem>>, %arg5: memref<1x128xf32, #tpu.memory_space<vmem>>, %arg6: memref<8x128xbf16, #tpu.memory_space<vmem>>, %arg7: memref<32x128xf32, #tpu.memory_space<vmem>>) attributes {dimension_semantics = [#tpu.dimension_semantics<parallel>], iteration_bounds = array<i64: 2>, scalar_prefetch = 0 : i64, scratch_operands = 1 : i64, tpu.core_type = #tpu.core_type<tc>, window_params = [{transform_indices = @transform_0, window_bounds = array<i64: 8, 32>}, {pipeline_mode = #tpu.pipeline_mode<synchronous>, transform_indices = @transform_1, window_bounds = array<i64: 32, 128>}, {pipeline_mode = #tpu.pipeline_mode<synchronous>, transform_indices = @transform_2, window_bounds = array<i64: 1, 128>}, {pipeline_mode = #tpu.pipeline_mode<synchronous>, transform_indices = @transform_3, window_bounds = array<i64: 128, 128>}, {pipeline_mode = #tpu.pipeline_mode<synchronous>, transform_indices = @transform_4, window_bounds = array<i64: 1, 128>}, {transform_indices = @transform_5, window_bounds = array<i64: 8, 128>}]} {
    %c0 = arith.constant 0 : index
    %c0_0 = arith.constant 0 : index
    %0 = vector.load %arg1[%c0, %c0_0] : memref<8x32xf32, #tpu.memory_space<vmem>>, vector<8x32xf32>
    %c0_1 = arith.constant 0 : index
    %c0_2 = arith.constant 0 : index
    %1 = vector.load %arg2[%c0_1, %c0_2] : memref<32x128xf32, #tpu.memory_space<vmem>>, vector<32x128xf32>
    %c0_3 = arith.constant 0 : index
    %c0_4 = arith.constant 0 : index
    %2 = vector.load %arg4[%c0_3, %c0_4] : memref<128x128xf32, #tpu.memory_space<vmem>>, vector<128x128xf32>
    %c0_5 = arith.constant 0 : index
    %c0_6 = arith.constant 0 : index
    %3 = vector.load %arg3[%c0_5, %c0_6] : memref<1x128xf32, #tpu.memory_space<vmem>>, vector<1x128xf32>
    %c0_7 = arith.constant 0 : index
    %c0_8 = arith.constant 0 : index
    %4 = vector.load %arg5[%c0_7, %c0_8] : memref<1x128xf32, #tpu.memory_space<vmem>>, vector<1x128xf32>
    %cst = arith.constant dense<0.000000e+00> : vector<8x128xf32>
    %5 = tpu.matmul %0, %1, %cst {dimension_numbers = #tpu.dot_dimension_numbers<[1], [0], [0], [1], [0, 0, 1, 1], [], []>} : vector<8x32xf32>, vector<32x128xf32>, vector<8x128xf32> -> vector<8x128xf32>
    %6 = vector.broadcast %3 : vector<1x128xf32> to vector<8x128xf32>
    %7 = arith.addf %5, %6 : vector<8x128xf32>
    %cst_9 = arith.constant 5.000000e-01 : f32
    %8 = vector.broadcast %cst_9 : f32 to vector<8x128xf32>
    %9 = arith.mulf %7, %8 : vector<8x128xf32>
    %cst_10 = arith.constant 0.000000e+00 : f32
    %10 = vector.broadcast %cst_10 : f32 to vector<8x128xf32>
    %cst_11 = arith.constant 5.000000e-01 : f32
    %11 = vector.broadcast %cst_11 : f32 to vector<8x128xf32>
    %12 = arith.mulf %10, %11 : vector<8x128xf32>
    %13 = arith.addf %12, %9 : vector<8x128xf32>
    %cst_12 = arith.constant 1.000000e+00 : f32
    %14 = vector.broadcast %cst_12 : f32 to vector<8x128xf32>
    %15 = arith.cmpf oge, %13, %14 : vector<8x128xf32>
    %16 = arith.extui %15 : vector<8x128xi1> to vector<8x128xi32>
    %17 = arith.sitofp %16 : vector<8x128xi32> to vector<8x128xf32>
    %c0_13 = arith.constant 0 : index
    %c0_14 = arith.constant 0 : index
    %18 = vector.load %arg7[%c0_13, %c0_14] : memref<32x128xf32, #tpu.memory_space<vmem>>, vector<8x128xf32>
    tpu.vector_store %arg7[%c0_13, %c0_14], %17 {strides = array<i32>} : memref<32x128xf32, #tpu.memory_space<vmem>>, vector<8x128xf32>,
    %cst_15 = arith.constant 0.000000e+00 : f32
    %19 = vector.broadcast %cst_15 : f32 to vector<8x128xf32>
    %20 = arith.select %15, %19, %13 : vector<8x128xi1>, vector<8x128xf32>
    %cst_16 = arith.constant 5.000000e-01 : f32
    %21 = vector.broadcast %cst_16 : f32 to vector<8x128xf32>
    %22 = arith.mulf %20, %21 : vector<8x128xf32>
    %23 = arith.addf %22, %9 : vector<8x128xf32>
    %cst_17 = arith.constant 1.000000e+00 : f32
    %24 = vector.broadcast %cst_17 : f32 to vector<8x128xf32>
    %25 = arith.cmpf oge, %23, %24 : vector<8x128xf32>
    %26 = arith.extui %25 : vector<8x128xi1> to vector<8x128xi32>
    %27 = arith.sitofp %26 : vector<8x128xi32> to vector<8x128xf32>
    %c8 = arith.constant 8 : index
    %c0_18 = arith.constant 0 : index
    %28 = vector.load %arg7[%c8, %c0_18] : memref<32x128xf32, #tpu.memory_space<vmem>>, vector<8x128xf32>
    tpu.vector_store %arg7[%c8, %c0_18], %27 {strides = array<i32>} : memref<32x128xf32, #tpu.memory_space<vmem>>, vector<8x128xf32>,
    %cst_19 = arith.constant 0.000000e+00 : f32
    %29 = vector.broadcast %cst_19 : f32 to vector<8x128xf32>
    %30 = arith.select %25, %29, %23 : vector<8x128xi1>, vector<8x128xf32>
    %cst_20 = arith.constant 5.000000e-01 : f32
    %31 = vector.broadcast %cst_20 : f32 to vector<8x128xf32>
    %32 = arith.mulf %30, %31 : vector<8x128xf32>
    %33 = arith.addf %32, %9 : vector<8x128xf32>
    %cst_21 = arith.constant 1.000000e+00 : f32
    %34 = vector.broadcast %cst_21 : f32 to vector<8x128xf32>
    %35 = arith.cmpf oge, %33, %34 : vector<8x128xf32>
    %36 = arith.extui %35 : vector<8x128xi1> to vector<8x128xi32>
    %37 = arith.sitofp %36 : vector<8x128xi32> to vector<8x128xf32>
    %c16 = arith.constant 16 : index
    %c0_22 = arith.constant 0 : index
    %38 = vector.load %arg7[%c16, %c0_22] : memref<32x128xf32, #tpu.memory_space<vmem>>, vector<8x128xf32>
    tpu.vector_store %arg7[%c16, %c0_22], %37 {strides = array<i32>} : memref<32x128xf32, #tpu.memory_space<vmem>>, vector<8x128xf32>,
    %cst_23 = arith.constant 0.000000e+00 : f32
    %39 = vector.broadcast %cst_23 : f32 to vector<8x128xf32>
    %40 = arith.select %35, %39, %33 : vector<8x128xi1>, vector<8x128xf32>
    %cst_24 = arith.constant 5.000000e-01 : f32
    %41 = vector.broadcast %cst_24 : f32 to vector<8x128xf32>
    %42 = arith.mulf %40, %41 : vector<8x128xf32>
    %43 = arith.addf %42, %9 : vector<8x128xf32>
    %cst_25 = arith.constant 1.000000e+00 : f32
    %44 = vector.broadcast %cst_25 : f32 to vector<8x128xf32>
    %45 = arith.cmpf oge, %43, %44 : vector<8x128xf32>
    %46 = arith.extui %45 : vector<8x128xi1> to vector<8x128xi32>
    %47 = arith.sitofp %46 : vector<8x128xi32> to vector<8x128xf32>
    %c24 = arith.constant 24 : index
    %c0_26 = arith.constant 0 : index
    %48 = vector.load %arg7[%c24, %c0_26] : memref<32x128xf32, #tpu.memory_space<vmem>>, vector<8x128xf32>
    tpu.vector_store %arg7[%c24, %c0_26], %47 {strides = array<i32>} : memref<32x128xf32, #tpu.memory_space<vmem>>, vector<8x128xf32>,
    %cst_27 = arith.constant 0.000000e+00 : f32
    %49 = vector.broadcast %cst_27 : f32 to vector<8x128xf32>
    %cst_28 = arith.constant 0.000000e+00 : f32
    %50 = vector.broadcast %cst_28 : f32 to vector<8x128xf32>
    %c0_29 = arith.constant 0 : index
    %c0_30 = arith.constant 0 : index
    %51 = vector.load %arg7[%c0_29, %c0_30] : memref<32x128xf32, #tpu.memory_space<vmem>>, vector<32x128xf32>
    %cst_31 = arith.constant dense<0.000000e+00> : vector<32x128xf32>
    %52 = tpu.matmul %51, %2, %cst_31 {dimension_numbers = #tpu.dot_dimension_numbers<[1], [0], [0], [1], [0, 0, 1, 1], [], []>} : vector<32x128xf32>, vector<128x128xf32>, vector<32x128xf32> -> vector<32x128xf32>
    %53 = vector.broadcast %4 : vector<1x128xf32> to vector<32x128xf32>
    %54 = arith.addf %52, %53 : vector<32x128xf32>
    %cst_32 = arith.constant 5.000000e-01 : f32
    %55 = vector.broadcast %cst_32 : f32 to vector<32x128xf32>
    %56 = arith.mulf %54, %55 : vector<32x128xf32>
    %57 = vector.extract_strided_slice %56 {offsets = [0, 0], sizes = [8, 128], strides = [1, 1]} : vector<32x128xf32> to vector<8x128xf32>
    %cst_33 = arith.constant 5.000000e-01 : f32
    %58 = vector.broadcast %cst_33 : f32 to vector<8x128xf32>
    %59 = arith.mulf %49, %58 : vector<8x128xf32>
    %60 = arith.addf %59, %57 : vector<8x128xf32>
    %cst_34 = arith.constant 1.000000e+00 : f32
    %61 = vector.broadcast %cst_34 : f32 to vector<8x128xf32>
    %62 = arith.cmpf oge, %60, %61 : vector<8x128xf32>
    %63 = arith.extui %62 : vector<8x128xi1> to vector<8x128xi32>
    %64 = arith.sitofp %63 : vector<8x128xi32> to vector<8x128xf32>
    %65 = arith.addf %50, %64 : vector<8x128xf32>
    %cst_35 = arith.constant 0.000000e+00 : f32
    %66 = vector.broadcast %cst_35 : f32 to vector<8x128xf32>
    %67 = arith.select %62, %66, %60 : vector<8x128xi1>, vector<8x128xf32>
    %68 = vector.extract_strided_slice %56 {offsets = [8, 0], sizes = [8, 128], strides = [1, 1]} : vector<32x128xf32> to vector<8x128xf32>
    %cst_36 = arith.constant 5.000000e-01 : f32
    %69 = vector.broadcast %cst_36 : f32 to vector<8x128xf32>
    %70 = arith.mulf %67, %69 : vector<8x128xf32>
    %71 = arith.addf %70, %68 : vector<8x128xf32>
    %cst_37 = arith.constant 1.000000e+00 : f32
    %72 = vector.broadcast %cst_37 : f32 to vector<8x128xf32>
    %73 = arith.cmpf oge, %71, %72 : vector<8x128xf32>
    %74 = arith.extui %73 : vector<8x128xi1> to vector<8x128xi32>
    %75 = arith.sitofp %74 : vector<8x128xi32> to vector<8x128xf32>
    %76 = arith.addf %65, %75 : vector<8x128xf32>
    %cst_38 = arith.constant 0.000000e+00 : f32
    %77 = vector.broadcast %cst_38 : f32 to vector<8x128xf32>
    %78 = arith.select %73, %77, %71 : vector<8x128xi1>, vector<8x128xf32>
    %79 = vector.extract_strided_slice %56 {offsets = [16, 0], sizes = [8, 128], strides = [1, 1]} : vector<32x128xf32> to vector<8x128xf32>
    %cst_39 = arith.constant 5.000000e-01 : f32
    %80 = vector.broadcast %cst_39 : f32 to vector<8x128xf32>
    %81 = arith.mulf %78, %80 : vector<8x128xf32>
    %82 = arith.addf %81, %79 : vector<8x128xf32>
    %cst_40 = arith.constant 1.000000e+00 : f32
    %83 = vector.broadcast %cst_40 : f32 to vector<8x128xf32>
    %84 = arith.cmpf oge, %82, %83 : vector<8x128xf32>
    %85 = arith.extui %84 : vector<8x128xi1> to vector<8x128xi32>
    %86 = arith.sitofp %85 : vector<8x128xi32> to vector<8x128xf32>
    %87 = arith.addf %76, %86 : vector<8x128xf32>
    %cst_41 = arith.constant 0.000000e+00 : f32
    %88 = vector.broadcast %cst_41 : f32 to vector<8x128xf32>
    %89 = arith.select %84, %88, %82 : vector<8x128xi1>, vector<8x128xf32>
    %90 = vector.extract_strided_slice %56 {offsets = [24, 0], sizes = [8, 128], strides = [1, 1]} : vector<32x128xf32> to vector<8x128xf32>
    %cst_42 = arith.constant 5.000000e-01 : f32
    %91 = vector.broadcast %cst_42 : f32 to vector<8x128xf32>
    %92 = arith.mulf %89, %91 : vector<8x128xf32>
    %93 = arith.addf %92, %90 : vector<8x128xf32>
    %cst_43 = arith.constant 1.000000e+00 : f32
    %94 = vector.broadcast %cst_43 : f32 to vector<8x128xf32>
    %95 = arith.cmpf oge, %93, %94 : vector<8x128xf32>
    %96 = arith.extui %95 : vector<8x128xi1> to vector<8x128xi32>
    %97 = arith.sitofp %96 : vector<8x128xi32> to vector<8x128xf32>
    %98 = arith.addf %87, %97 : vector<8x128xf32>
    %cst_44 = arith.constant 2.500000e-01 : f32
    %99 = vector.broadcast %cst_44 : f32 to vector<8x128xf32>
    %100 = arith.mulf %98, %99 : vector<8x128xf32>
    %101 = arith.truncf %100 : vector<8x128xf32> to vector<8x128xbf16>
    %c0_45 = arith.constant 0 : index
    %c0_46 = arith.constant 0 : index
    %102 = vector.load %arg6[%c0_45, %c0_46] : memref<8x128xbf16, #tpu.memory_space<vmem>>, vector<8x128xbf16>
    tpu.vector_store %arg6[%c0_45, %c0_46], %101 {strides = array<i32>} : memref<8x128xbf16, #tpu.memory_space<vmem>>, vector<8x128xbf16>,
    return
  }
  func.func @transform_0(%arg0: i32) -> (i32, i32) {
    %c0_i32 = arith.constant 0 : i32
    %c0_i32_0 = arith.constant 0 : i32
    return %arg0, %c0_i32 : i32, i32
  }
  func.func @transform_1(%arg0: i32) -> (i32, i32) {
    %c0_i32 = arith.constant 0 : i32
    %c0_i32_0 = arith.constant 0 : i32
    %c0_i32_1 = arith.constant 0 : i32
    return %c0_i32, %c0_i32_0 : i32, i32
  }
  func.func @transform_2(%arg0: i32) -> (i32, i32) {
    %c0_i32 = arith.constant 0 : i32
    %c0_i32_0 = arith.constant 0 : i32
    %c0_i32_1 = arith.constant 0 : i32
    return %c0_i32, %c0_i32_0 : i32, i32
  }
  func.func @transform_3(%arg0: i32) -> (i32, i32) {
    %c0_i32 = arith.constant 0 : i32
    %c0_i32_0 = arith.constant 0 : i32
    %c0_i32_1 = arith.constant 0 : i32
    return %c0_i32, %c0_i32_0 : i32, i32
  }
  func.func @transform_4(%arg0: i32) -> (i32, i32) {
    %c0_i32 = arith.constant 0 : i32
    %c0_i32_0 = arith.constant 0 : i32
    %c0_i32_1 = arith.constant 0 : i32
    return %c0_i32, %c0_i32_0 : i32, i32
  }
  func.func @transform_5(%arg0: i32) -> (i32, i32) {
    %c0_i32 = arith.constant 0 : i32
    %c0_i32_0 = arith.constant 0 : i32
    return %arg0, %c0_i32 : i32, i32
  }
}

module attributes {stable_mosaic.version = 11 : i64} {
  func.func @_spiking_mlp_kernel(%arg0: i32, %arg1: memref<8x32xf32, #tpu.memory_space<vmem>>, %arg2: memref<32x128xf32, #tpu.memory_space<vmem>>, %arg3: memref<1x128xf32, #tpu.memory_space<vmem>>, %arg4: memref<128x128xf32, #tpu.memory_space<vmem>>, %arg5: memref<1x128xf32, #tpu.memory_space<vmem>>, %arg6: memref<8x128xbf16, #tpu.memory_space<vmem>>, %arg7: memref<32x128xf32, #tpu.memory_space<vmem>>) attributes {dimension_semantics = [#tpu.dimension_semantics<parallel>], iteration_bounds = array<i64: 2>, scalar_prefetch = 0 : i64, scratch_operands = 1 : i64, tpu.core_type = #tpu.core_type<tc>, window_params = [{transform_indices = @transform_0, window_bounds = array<i64: 8, 32>}, {pipeline_mode = #tpu.pipeline_mode<synchronous>, transform_indices = @transform_1, window_bounds = array<i64: 32, 128>}, {pipeline_mode = #tpu.pipeline_mode<synchronous>, transform_indices = @transform_2, window_bounds = array<i64: 1, 128>}, {pipeline_mode = #tpu.pipeline_mode<synchronous>, transform_indices = @transform_3, window_bounds = array<i64: 128, 128>}, {pipeline_mode = #tpu.pipeline_mode<synchronous>, transform_indices = @transform_4, window_bounds = array<i64: 1, 128>}, {transform_indices = @transform_5, window_bounds = array<i64: 8, 128>}]} {
    %c0 = arith.constant 0 : index
    %c0_0 = arith.constant 0 : index
    %0 = vector.load %arg1[%c0, %c0_0] : memref<8x32xf32, #tpu.memory_space<vmem>>, vector<8x32xf32>
    %c0_1 = arith.constant 0 : index
    %c0_2 = arith.constant 0 : index
    %1 = vector.load %arg2[%c0_1, %c0_2] : memref<32x128xf32, #tpu.memory_space<vmem>>, vector<32x128xf32>
    %c0_3 = arith.constant 0 : index
    %c0_4 = arith.constant 0 : index
    %2 = vector.load %arg4[%c0_3, %c0_4] : memref<128x128xf32, #tpu.memory_space<vmem>>, vector<128x128xf32>
    %c0_5 = arith.constant 0 : index
    %c0_6 = arith.constant 0 : index
    %3 = vector.load %arg3[%c0_5, %c0_6] : memref<1x128xf32, #tpu.memory_space<vmem>>, vector<1x128xf32>
    %c0_7 = arith.constant 0 : index
    %c0_8 = arith.constant 0 : index
    %4 = vector.load %arg5[%c0_7, %c0_8] : memref<1x128xf32, #tpu.memory_space<vmem>>, vector<1x128xf32>
    %cst = arith.constant dense<0.000000e+00> : vector<8x128xf32>
    %5 = tpu.matmul %0, %1, %cst {dimension_numbers = #tpu.dot_dimension_numbers<[1], [0], [0], [1], [0, 0, 1, 1], [], []>} : vector<8x32xf32>, vector<32x128xf32>, vector<8x128xf32> -> vector<8x128xf32>
    %6 = vector.broadcast %3 : vector<1x128xf32> to vector<8x128xf32>
    %7 = arith.addf %5, %6 : vector<8x128xf32>
    %cst_9 = arith.constant 5.000000e-01 : f32
    %8 = vector.broadcast %cst_9 : f32 to vector<8x128xf32>
    %9 = arith.mulf %7, %8 : vector<8x128xf32>
    %cst_10 = arith.constant 0.000000e+00 : f32
    %10 = vector.broadcast %cst_10 : f32 to vector<8x128xf32>
    %cst_11 = arith.constant 5.000000e-01 : f32
    %11 = vector.broadcast %cst_11 : f32 to vector<8x128xf32>
    %12 = arith.mulf %10, %11 : vector<8x128xf32>
    %13 = arith.addf %12, %9 : vector<8x128xf32>
    %cst_12 = arith.constant 1.000000e+00 : f32
    %14 = vector.broadcast %cst_12 : f32 to vector<8x128xf32>
    %15 = arith.cmpf oge, %13, %14 : vector<8x128xf32>
    %16 = arith.extui %15 : vector<8x128xi1> to vector<8x128xi32>
    %17 = arith.sitofp %16 : vector<8x128xi32> to vector<8x128xf32>
    %c0_13 = arith.constant 0 : index
    %c0_14 = arith.constant 0 : index
    %18 = vector.load %arg7[%c0_13, %c0_14] : memref<32x128xf32, #tpu.memory_space<vmem>>, vector<8x128xf32>
    tpu.vector_store %arg7[%c0_13, %c0_14], %17 {strides = array<i32>} : memref<32x128xf32, #tpu.memory_space<vmem>>, vector<8x128xf32>,
    %cst_15 = arith.constant 0.000000e+00 : f32
    %19 = vector.broadcast %cst_15 : f32 to vector<8x128xf32>
    %20 = arith.select %15, %19, %13 : vector<8x128xi1>, vector<8x128xf32>
    %cst_16 = arith.constant 5.000000e-01 : f32
    %21 = vector.broadcast %cst_16 : f32 to vector<8x128xf32>
    %22 = arith.mulf %20, %21 : vector<8x128xf32>
    %23 = arith.addf %22, %9 : vector<8x128xf32>
    %cst_17 = arith.constant 1.000000e+00 : f32
    %24 = vector.broadcast %cst_17 : f32 to vector<8x128xf32>
    %25 = arith.cmpf oge, %23, %24 : vector<8x128xf32>
    %26 = arith.extui %25 : vector<8x128xi1> to vector<8x128xi32>
    %27 = arith.sitofp %26 : vector<8x128xi32> to vector<8x128xf32>
    %c8 = arith.constant 8 : index
    %c0_18 = arith.constant 0 : index
    %28 = vector.load %arg7[%c8, %c0_18] : memref<32x128xf32, #tpu.memory_space<vmem>>, vector<8x128xf32>
    tpu.vector_store %arg7[%c8, %c0_18], %27 {strides = array<i32>} : memref<32x128xf32, #tpu.memory_space<vmem>>, vector<8x128xf32>,
    %cst_19 = arith.constant 0.000000e+00 : f32
    %29 = vector.broadcast %cst_19 : f32 to vector<8x128xf32>
    %30 = arith.select %25, %29, %23 : vector<8x128xi1>, vector<8x128xf32>
    %cst_20 = arith.constant 5.000000e-01 : f32
    %31 = vector.broadcast %cst_20 : f32 to vector<8x128xf32>
    %32 = arith.mulf %30, %31 : vector<8x128xf32>
    %33 = arith.addf %32, %9 : vector<8x128xf32>
    %cst_21 = arith.constant 1.000000e+00 : f32
    %34 = vector.broadcast %cst_21 : f32 to vector<8x128xf32>
    %35 = arith.cmpf oge, %33, %34 : vector<8x128xf32>
    %36 = arith.extui %35 : vector<8x128xi1> to vector<8x128xi32>
    %37 = arith.sitofp %36 : vector<8x128xi32> to vector<8x128xf32>
    %c16 = arith.constant 16 : index
    %c0_22 = arith.constant 0 : index
    %38 = vector.load %arg7[%c16, %c0_22] : memref<32x128xf32, #tpu.memory_space<vmem>>, vector<8x128xf32>
    tpu.vector_store %arg7[%c16, %c0_22], %37 {strides = array<i32>} : memref<32x128xf32, #tpu.memory_space<vmem>>, vector<8x128xf32>,
    %cst_23 = arith.constant 0.000000e+00 : f32
    %39 = vector.broadcast %cst_23 : f32 to vector<8x128xf32>
    %40 = arith.select %35, %39, %33 : vector<8x128xi1>, vector<8x128xf32>
    %cst_24 = arith.constant 5.000000e-01 : f32
    %41 = vector.broadcast %cst_24 : f32 to vector<8x128xf32>
    %42 = arith.mulf %40, %41 : vector<8x128xf32>
    %43 = arith.addf %42, %9 : vector<8x128xf32>
    %cst_25 = arith.constant 1.000000e+00 : f32
    %44 = vector.broadcast %cst_25 : f32 to vector<8x128xf32>
    %45 = arith.cmpf oge, %43, %44 : vector<8x128xf32>
    %46 = arith.extui %45 : vector<8x128xi1> to vector<8x128xi32>
    %47 = arith.sitofp %46 : vector<8x128xi32> to vector<8x128xf32>
    %c24 = arith.constant 24 : index
    %c0_26 = arith.constant 0 : index
    %48 = vector.load %arg7[%c24, %c0_26] : memref<32x128xf32, #tpu.memory_space<vmem>>, vector<8x128xf32>
    tpu.vector_store %arg7[%c24, %c0_26], %47 {strides = array<i32>} : memref<32x128xf32, #tpu.memory_space<vmem>>, vector<8x128xf32>,
    %cst_27 = arith.constant 0.000000e+00 : f32
    %49 = vector.broadcast %cst_27 : f32 to vector<8x128xf32>
    %cst_28 = arith.constant 0.000000e+00 : f32
    %50 = vector.broadcast %cst_28 : f32 to vector<8x128xf32>
    %c0_29 = arith.constant 0 : index
    %c0_30 = arith.constant 0 : index
    %51 = vector.load %arg7[%c0_29, %c0_30] : memref<32x128xf32, #tpu.memory_space<vmem>>, vector<32x128xf32>
    %cst_31 = arith.constant dense<0.000000e+00> : vector<32x128xf32>
    %52 = tpu.matmul %51, %2, %cst_31 {dimension_numbers = #tpu.dot_dimension_numbers<[1], [0], [0], [1], [0, 0, 1, 1], [], []>} : vector<32x128xf32>, vector<128x128xf32>, vector<32x128xf32> -> vector<32x128xf32>
    %53 = vector.broadcast %4 : vector<1x128xf32> to vector<32x128xf32>
    %54 = arith.addf %52, %53 : vector<32x128xf32>
    %cst_32 = arith.constant 5.000000e-01 : f32
    %55 = vector.broadcast %cst_32 : f32 to vector<32x128xf32>
    %56 = arith.mulf %54, %55 : vector<32x128xf32>
    %57 = vector.extract_strided_slice %56 {offsets = [0, 0], sizes = [8, 128], strides = [1, 1]} : vector<32x128xf32> to vector<8x128xf32>
    %cst_33 = arith.constant 5.000000e-01 : f32
    %58 = vector.broadcast %cst_33 : f32 to vector<8x128xf32>
    %59 = arith.mulf %49, %58 : vector<8x128xf32>
    %60 = arith.addf %59, %57 : vector<8x128xf32>
    %cst_34 = arith.constant 1.000000e+00 : f32
    %61 = vector.broadcast %cst_34 : f32 to vector<8x128xf32>
    %62 = arith.cmpf oge, %60, %61 : vector<8x128xf32>
    %63 = arith.extui %62 : vector<8x128xi1> to vector<8x128xi32>
    %64 = arith.sitofp %63 : vector<8x128xi32> to vector<8x128xf32>
    %65 = arith.addf %50, %64 : vector<8x128xf32>
    %cst_35 = arith.constant 0.000000e+00 : f32
    %66 = vector.broadcast %cst_35 : f32 to vector<8x128xf32>
    %67 = arith.select %62, %66, %60 : vector<8x128xi1>, vector<8x128xf32>
    %68 = vector.extract_strided_slice %56 {offsets = [8, 0], sizes = [8, 128], strides = [1, 1]} : vector<32x128xf32> to vector<8x128xf32>
    %cst_36 = arith.constant 5.000000e-01 : f32
    %69 = vector.broadcast %cst_36 : f32 to vector<8x128xf32>
    %70 = arith.mulf %67, %69 : vector<8x128xf32>
    %71 = arith.addf %70, %68 : vector<8x128xf32>
    %cst_37 = arith.constant 1.000000e+00 : f32
    %72 = vector.broadcast %cst_37 : f32 to vector<8x128xf32>
    %73 = arith.cmpf oge, %71, %72 : vector<8x128xf32>
    %74 = arith.extui %73 : vector<8x128xi1> to vector<8x128xi32>
    %75 = arith.sitofp %74 : vector<8x128xi32> to vector<8x128xf32>
    %76 = arith.addf %65, %75 : vector<8x128xf32>
    %cst_38 = arith.constant 0.000000e+00 : f32
    %77 = vector.broadcast %cst_38 : f32 to vector<8x128xf32>
    %78 = arith.select %73, %77, %71 : vector<8x128xi1>, vector<8x128xf32>
    %79 = vector.extract_strided_slice %56 {offsets = [16, 0], sizes = [8, 128], strides = [1, 1]} : vector<32x128xf32> to vector<8x128xf32>
    %cst_39 = arith.constant 5.000000e-01 : f32
    %80 = vector.broadcast %cst_39 : f32 to vector<8x128xf32>
    %81 = arith.mulf %78, %80 : vector<8x128xf32>
    %82 = arith.addf %81, %79 : vector<8x128xf32>
    %cst_40 = arith.constant 1.000000e+00 : f32
    %83 = vector.broadcast %cst_40 : f32 to vector<8x128xf32>
    %84 = arith.cmpf oge, %82, %83 : vector<8x128xf32>
    %85 = arith.extui %84 : vector<8x128xi1> to vector<8x128xi32>
    %86 = arith.sitofp %85 : vector<8x128xi32> to vector<8x128xf32>
    %87 = arith.addf %76, %86 : vector<8x128xf32>
    %cst_41 = arith.constant 0.000000e+00 : f32
    %88 = vector.broadcast %cst_41 : f32 to vector<8x128xf32>
    %89 = arith.select %84, %88, %82 : vector<8x128xi1>, vector<8x128xf32>
    %90 = vector.extract_strided_slice %56 {offsets = [24, 0], sizes = [8, 128], strides = [1, 1]} : vector<32x128xf32> to vector<8x128xf32>
    %cst_42 = arith.constant 5.000000e-01 : f32
    %91 = vector.broadcast %cst_42 : f32 to vector<8x128xf32>
    %92 = arith.mulf %89, %91 : vector<8x128xf32>
    %93 = arith.addf %92, %90 : vector<8x128xf32>
    %cst_43 = arith.constant 1.000000e+00 : f32
    %94 = vector.broadcast %cst_43 : f32 to vector<8x128xf32>
    %95 = arith.cmpf oge, %93, %94 : vector<8x128xf32>
    %96 = arith.extui %95 : vector<8x128xi1> to vector<8x128xi32>
    %97 = arith.sitofp %96 : vector<8x128xi32> to vector<8x128xf32>
    %98 = arith.addf %87, %97 : vector<8x128xf32>
    %cst_44 = arith.constant 2.500000e-01 : f32
    %99 = vector.broadcast %cst_44 : f32 to vector<8x128xf32>
    %100 = arith.mulf %98, %99 : vector<8x128xf32>
    %101 = arith.truncf %100 : vector<8x128xf32> to vector<8x128xbf16>
    %c0_45 = arith.constant 0 : index
    %c0_46 = arith.constant 0 : index
    %102 = vector.load %arg6[%c0_45, %c0_46] : memref<8x128xbf16, #tpu.memory_space<vmem>>, vector<8x128xbf16>
    tpu.vector_store %arg6[%c0_45, %c0_46], %101 {strides = array<i32>} : memref<8x128xbf16, #tpu.memory_space<vmem>>, vector<8x128xbf16>,
    return
  }
  func.func @transform_0(%arg0: i32) -> (i32, i32) {
    %c0_i32 = arith.constant 0 : i32
    %c0_i32_0 = arith.constant 0 : i32
    return %arg0, %c0_i32 : i32, i32
  }
  func.func @transform_1(%arg0: i32) -> (i32, i32) {
    %c0_i32 = arith.constant 0 : i32
    %c0_i32_0 = arith.constant 0 : i32
    %c0_i32_1 = arith.constant 0 : i32
    return %c0_i32, %c0_i32_0 : i32, i32
  }
  func.func @transform_2(%arg0: i32) -> (i32, i32) {
    %c0_i32 = arith.constant 0 : i32
    %c0_i32_0 = arith.constant 0 : i32
    %c0_i32_1 = arith.constant 0 : i32
    return %c0_i32, %c0_i32_0 : i32, i32
  }
  func.func @transform_3(%arg0: i32) -> (i32, i32) {
    %c0_i32 = arith.constant 0 : i32
    %c0_i32_0 = arith.constant 0 : i32
    %c0_i32_1 = arith.constant 0 : i32
    return %c0_i32, %c0_i32_0 : i32, i32
  }
  func.func @transform_4(%arg0: i32) -> (i32, i32) {
    %c0_i32 = arith.constant 0 : i32
    %c0_i32_0 = arith.constant 0 : i32
    %c0_i32_1 = arith.constant 0 : i32
    return %c0_i32, %c0_i32_0 : i32, i32
  }
  func.func @transform_5(%arg0: i32) -> (i32, i32) {
    %c0_i32 = arith.constant 0 : i32
    %c0_i32_0 = arith.constant 0 : i32
    return %arg0, %c0_i32 : i32, i32
  }
}

</mosaic_0001>

<bundles_post_ra>
// kernel: tpu_custom_call.1
= control target key start
LH: loop header
LB: loop body
LE: loop exit
PB: predicated region body
PF: predicated region fallthrough
CT: control target
= control target key end

     0   :  { %10 = vsyncpa [#allocation4], 0  ;;  %s1285_s0 = inlined_call_operand.hbm [shape: f32[16,32], index: 0, kind: input, shape index: {}]   ;;  %s1286_s1 = inlined_call_operand.hbm [shape: f32[32,128], index: 1, kind: input, shape index: {}]   ;;  %s1287_s2 = inlined_call_operand.vmem [shape: f32[1,128], index: 2, kind: input, shape index: {}]   ;;  %s1288_s3 = inlined_call_operand.hbm [shape: f32[128,128], index: 3, kind: input, shape index: {}]   ;;  %s1289_s4 = inlined_call_operand.vmem [shape: f32[1,128], index: 4, kind: input, shape index: {}]   ;;  %s1290_s5 = inlined_call_operand.hbm [shape: bf16[16,128], index: 5, kind: output, shape index: {}]  }
   0x1   :  { %12 = vsyncpa [#allocation4 + $0x1], 0 }
   0x2   :  { %13 = vsyncpa [#allocation7], 0 }
   0x3   :  { %14 = vsyncpa [#allocation5], 0 }
   0x4   :  { %16 = vsyncpa [#allocation5 + $0x1], 0  ;;  %s1044_s18 = smov 0   ;;  %s1046_s19 = smov 0  }
   0x5   :  { %s1048_s20 = smov 0   ;;  %s1050_s21 = smov 0  }
   0x6 LB: > { %s1065_s22 = sadd.s32 4294967295, %s1002_s21   ;;  %s630_s23 = sadd.s32 4294967294, %s1002_s21   ;;  %s1002_s21 = sphi %s1050_s21, %s1310_s21   ;;  %s998_s20 = sphi %s1048_s20, %s1309_s20   ;;  %s994_s19 = sphi %s1046_s19, %s1308_s19   ;;  %s990_s18 = sphi %s1044_s18, %s1307_s18  }
   0x7   : > { %p42_p0 = scmp.ne.s32.totalorder %s994_s19, %s990_s18  ;;  %p1291_p1 = scmp.eq.s32.totalorder %s1065_s22, 0 }
   0x8   : > { %p156_p3 = scmp.eq.s32.totalorder %s630_s23, 1  ;;  %p631_p5 = scmp.ge.s32.totalorder %s1002_s21, 1 }
   0x9   : > { %p1074_p4 = por %p1291_p1, %p42_p0  ;;  %p163_p7 = scmp.lt.s32.totalorder %s1002_s21, 3 }
   0xa   : > { %p1079_p6 = por %p156_p3, %p42_p0  ;;  %s1004_s27 = smov [#allocation6]  }
   0xb   : > { %s1294_s24 = scalar_select %p1074_p4, 1, 0 }
   0xc   : > { %s1295_s25 = scalar_select %p1079_p6, 1, 0 }
   0xd   : > { %p1084_p8 = pnand %p631_p5, %p163_p7  ;;  %s175_s28 = sshll.u32 %s1004_s27, 4  ;;  %s1088_s28 = int_to_ptr.vmem [resolvable:$true] %s175_s28 }
   0xe   : > { %s1005_s30 = smov [#allocation8]   ;;  %s846_s9 = scalar_lea.hbm %s1286_s1, 512 }
   0xf   : > { %p785_p9 = pneg %p1084_p8  ;;  %s191_s6 = sshll.u32 %s1005_s30, 4  ;;  %s1099_s6 = int_to_ptr.vmem [resolvable:$true] %s191_s6 }
  0x10   : > { %p847_p12 = scmp.ne.s32.totalorder %s1286_s1, %s846_s9  ;;  %p853_p5 = scmp.lt.u32.totalorder %s846_s9, %s1286_s1 }
  0x11   : > { %p1095_p11 = pnand %p785_p9, %p1291_p1 }
  0x13   : > { %p848_p13 = pneg %p1095_p11 }
  0x15   : > { %p849_p0 = pnand %p848_p13, %p847_p12 }
  0x17   : > { %p850_p3 = pneg %p849_p0 }
  0x19   : > { %p855_p7 = pnand %p853_p5, %p850_p3 }
  0x1b   : > { %858 = shalt.err (!%p855_p7)
}
  0x1c   : > { %s859_s14 = scalar_lea.vmem %s1088_s28, 512  ;;  %p867_p2 = scmp.lt.s32.totalorder %s1088_s28, %s1088_s28 }
  0x1d   : > { %p860_p9 = scmp.ne.s32.totalorder %s1088_s28, %s859_s14  ;;  %p868_p12 = scmp.lt.s32.totalorder %s859_s14, %s859_s14 }
  0x1f   : > { %p862_p10 = pnand %p860_p9, %p848_p13  ;;  %p869_p0 = por %p868_p12, %p867_p2 }
  0x21   : > { %p863_p1 = pneg %p862_p10 }
  0x23   : > { %p870_p6 = pnand %p869_p0, %p863_p1 }
  0x25   : > { %873 = shalt.err (!%p870_p6)
}
  0x26   : > { %s1006_s15 = smov 128   ;;  %s1007_s16 = smov 8  }
  0x27   : > { %788 = dma.hbm_to_vmem [thread:$0]  (!%p1095_p11), %s1286_s1, 512, %s1088_s28, [#allocation7], %s1006_s15, %s1006_s15, %s1007_s16  }
  0x28   : > { %s874_s7 = scalar_lea.hbm %s1288_s3, 2048 }
  0x29   : > { %p875_p2 = scmp.ne.s32.totalorder %s1288_s3, %s874_s7  ;;  %p881_p10 = scmp.lt.u32.totalorder %s874_s7, %s1288_s3 }
  0x2b   : > { %p877_p1 = pnand %p875_p2, %p848_p13 }
  0x2d   : > { %p878_p6 = pneg %p877_p1 }
  0x2f   : > { %p883_p3 = pnand %p881_p10, %p878_p6 }
  0x31   : > { %886 = shalt.err (!%p883_p3)
}
  0x32   : > { %s887_s28 = scalar_lea.vmem %s1099_s6, 2048  ;;  %p895_p12 = scmp.lt.s32.totalorder %s1099_s6, %s1099_s6 }
  0x33   : > { %p888_p5 = scmp.ne.s32.totalorder %s1099_s6, %s887_s28  ;;  %p896_p0 = scmp.lt.s32.totalorder %s887_s28, %s887_s28 }
  0x35   : > { %p890_p7 = pnand %p888_p5, %p848_p13  ;;  %p897_p2 = por %p896_p0, %p895_p12 }
  0x37   : > { %p891_p9 = pneg %p890_p7 }
  0x39   : > { %p898_p1 = pnand %p897_p2, %p891_p9 }
  0x3b   : > { %901 = shalt.err (!%p898_p1)
}
  0x3c   : > { %791 = dma.hbm_to_vmem [thread:$0]  (!%p1095_p11), %s1288_s3, 2048, %s1099_s6, [#allocation7], %s1006_s15, %s1006_s15, %s1007_s16  }
  0x3d   : > { %s1154_s14 = sadd.s32 1, %s1002_s21   ;;  %s29_s29 = sadd.s32 1, %s998_s20 }
  0x3e   : > { %s26_s17 = ssub.s32 %s1002_s21, %s1154_s14  ;;  %p36_p13 = scmp.ne.s32.totalorder %s998_s20, %s994_s19 }
  0x3f   : > { %p27_p6 = scmp.eq.s32.totalorder %s26_s17, 0  ;;  %p37_p10 = scmp.eq.s32.totalorder %s1002_s21, 0 }
  0x40   : > { %p1298_p3 = scmp.eq.s32.totalorder %s1065_s22, 1  ;;  %p802_p7 = scmp.lt.s32.totalorder %s1002_s21, 2 }
  0x41   : > { %s1170_s27 = scalar_select %p27_p6, %s998_s20, %s29_s29  }
  0x42   : > { %p1164_p5 = por %p1298_p3, %p36_p13  ;;  %p38_p9 = por %p37_p10, %p36_p13 }
  0x43   : > { %s208_s30 = sand.u32 1, %s998_s20   ;;  %s636_s6 = sshll.u32 %s1002_s21, 7 }
  0x44   : > { %s1299_s23 = scalar_select %p1164_p5, 1, 0 }
  0x45   : > { %s635_s7 = sshll.u32 %s208_s30, 3  ;;  %s1177_s8 = scalar_lea.hbm %s1285_s0, %s636_s6 }
  0x46   : > { %s212_s9 = scalar_lea.vmem [#allocation3], %s635_s7  ;;  %p1181_p11 = pnand %p802_p7, %p38_p9 }
  0x47   : > { %s219_s10 = sshll.u32 %s212_s9, 4  ;;  %s209_s28 = scalar_lea.sflag [#allocation4], %s208_s30  ;;  %s1179_s10 = int_to_ptr.vmem [resolvable:$true] %s219_s10 }
  0x48   : > { %s902_s12 = scalar_lea.hbm %s1177_s8, 128  ;;  %p904_p0 = pneg %p1181_p11 }
  0x49   : > { %p903_p12 = scmp.ne.s32.totalorder %s1177_s8, %s902_s12  ;;  %s907_s17 = scalar_lea.hbm %s1285_s0, 256 }
  0x4a   : > { %p908_p13 = scmp.lt.u32.totalorder %s1177_s8, %s1285_s0  ;;  %p909_p6 = scmp.lt.u32.totalorder %s907_s17, %s902_s12 }
  0x4b   : > { %p905_p2 = pnand %p904_p0, %p903_p12  ;;  %p911_p3 = scmp.lt.u32.totalorder %s902_s12, %s1177_s8 }
  0x4c   : > { %p910_p10 = por %p909_p6, %p908_p13 }
  0x4d   : > { %p906_p1 = pneg %p905_p2 }
  0x4e   : > { %p912_p7 = por %p911_p3, %p910_p10 }
  0x50   : > { %p913_p9 = pnand %p912_p7, %p906_p1 }
  0x52   : > { %916 = shalt.err (!%p913_p9)
}
  0x53   : > { %s917_s30 = scalar_lea.vmem %s1179_s10, 128  ;;  %s1008_s15 = smov [#allocation3]  }
  0x54   : > { %p918_p12 = scmp.ne.s32.totalorder %s1179_s10, %s917_s30  ;;  %s922_s16 = sshll.u32 %s1008_s15, 4  ;;  %s923_s16 = int_to_ptr.vmem [resolvable:$false] %s922_s16 }
  0x55   : > { %s924_s9 = scalar_lea.vmem %s923_s16, 256  ;;  %p925_p4 = scmp.lt.s32.totalorder %s1179_s10, %s923_s16 }
  0x56   : > { %p920_p2 = pnand %p918_p12, %p904_p0  ;;  %p926_p13 = scmp.lt.s32.totalorder %s924_s9, %s917_s30 }
  0x58   : > { %p921_p5 = pneg %p920_p2  ;;  %p927_p6 = por %p926_p13, %p925_p4 }
  0x5a   : > { %p928_p10 = pnand %p927_p6, %p921_p5 }
  0x5c   : > { %931 = shalt.err (!%p928_p10)
}
  0x5d   : > { %795 = dma.hbm_to_vmem [thread:$0]  (!%p1181_p11), %s1177_s8, 128, %s1179_s10, %s209_s28  }
  0x5e   : > { %228 = sbr.rel (%p1084_p8) target bundleno = 597 (0x255), region = 40  ;;  %s1213_s12 = sand.u32 (!%p1084_p8), 1, %s994_s19  }
  0x5f   : > { %s638_s13 = sshll.u32 (!%p1084_p8), %s1213_s12, 3  ;;  %s231_s29 = scalar_lea.sflag (!%p1084_p8), [#allocation4], %s1213_s12 }
  0x60   : > { %s234_s17 = scalar_lea.vmem (!%p1084_p8), [#allocation3], %s638_s13  ;;  %p1301_p4 = scmp.ne.s32.totalorder (!%p1084_p8), %s1294_s24, 0 }
  0x65   : > { %977 = dma.done.wait (%p1301_p4), %s231_s29, 128  }
  0x66   : > { %979 = vsyncadd (%p1301_p4), %s231_s29, 4294967168  ;;  %p1302_p5 = scmp.eq.s32.totalorder %s1065_s22, 0 }
  0x68   : > { %981 = dma.done.wait (%p1302_p5), [#allocation7], 2560   ;;  %p1303_p11 = pmov %p1302_p5 }
  0x69   : > { %v1009_v0 = vmov 0.0|0.0   ;;  %vm1010_vm0 = vmmov 0   ;;  %v1011_v1 = vmov 0.0   ;;  %v270_v2 = vld [vmem:[#allocation6] sm:$0xff]  ;;  %v271_v3 = vld [vmem:[#allocation6 + $0x8] sm:$0xff]  ;;  %v272_v4 = vld [vmem:[#allocation6 + $0x10] sm:$0xff] }
  0x6a   : > { %983 = vsyncadd (%p1303_p11), [#allocation7], 4294964736  ;;  %735 = vmatprep.subr.bf16.mxu0 %v1009_v0  ;;  %694 = vmatprep.mubr.msk.f32.mxu0 %vm1010_vm0, %v1011_v1  ;;  %v736_v5 = vpack.c.bf16 %v271_v3, %v270_v2  ;;  %v273_v6 = vld [vmem:[#allocation6 + $0x18] sm:$0xff]  ;;  %v274_v7 = vld [vmem:[#allocation8] sm:$0xff]  ;;  %vm298_vm1 = vcmask 261120   ;;  %v1012_v39 = vmov 1.0  }
  0x6b   : > { %v275_v8 = vld [vmem:[#allocation8 + $0x8] sm:$0xff]  ;;  %v276_v9 = vld [vmem:[#allocation8 + $0x10] sm:$0xff]  ;;  %v277_v10 = vld [vmem:[#allocation8 + $0x18] sm:$0xff]  ;;  %v739_v11 = vpack.c.bf16 %v273_v6, %v272_v4  ;;  %s641_s11 = sshll.u32 %s1213_s12, 2  ;;  %s654_s28 = sshll.u32 %s1065_s22, 6 }
  0x6c   : > { %737 = vmatpush3.bf16.msra.mxu0 %v736_v5  ;;  %v741_v12 = vpack.c.bf16 %v275_v8, %v274_v7  ;;  %v745_v13 = vpack.c.bf16 %v277_v10, %v276_v9  ;;  %v278_v14 = vld [vmem:[#allocation8 + $0x20] sm:$0xff]  ;;  %v279_v15 = vld [vmem:[#allocation8 + $0x28] sm:$0xff]  ;;  %v269_v16 = vld [vmem:[%s234_s17] sm:$0xff]  ;;  %s268_s7 = scalar_lea.vmem [#allocation9], %s641_s11  ;;  %s1241_s16 = scalar_lea.hbm %s1290_s5, %s654_s28 }
  0x6d   : > { %738 = vmatprep.subr.bf16.mxu0 %v1009_v0  ;;  %v749_v17 = vpack.c.bf16 %v279_v15, %v278_v14  ;;  %v280_v18 = vld [vmem:[#allocation8 + $0x30] sm:$0xff]  ;;  %v281_v19 = vld [vmem:[#allocation8 + $0x38] sm:$0xff]  ;;  %v282_v21 = vld [vmem:[#allocation8 + $0x40] sm:$0xff]  ;;  %s541_s6 = sshll.u32 %s268_s7, 4  ;;  %s528_s9 = scalar_lea.sflag [#allocation5], %s1213_s12  ;;  %s1243_s6 = int_to_ptr.vmem [resolvable:$true] %s541_s6 }
  0x6e   : > { %742 = vmatprep.subr.bf16.mxu1 %v741_v12  ;;  %v753_v20 = vpack.c.bf16 %v281_v19, %v280_v18  ;;  %v283_v22 = vld [vmem:[#allocation8 + $0x48] sm:$0xff]  ;;  %v284_v24 = vld [vmem:[#allocation8 + $0x50] sm:$0xff]  ;;  %v285_v25 = vld [vmem:[#allocation8 + $0x58] sm:$0xff]  ;;  %s932_s13 = scalar_lea.vmem %s1243_s6, 64  ;;  %p1304_p0 = scmp.ne.s32.totalorder %s1299_s23, 0 }
  0x6f   : > { %744 = vmatpush3.bf16.msra.mxu1 %v741_v12  ;;  %v757_v23 = vpack.c.bf16 %v283_v22, %v282_v21  ;;  %v761_v26 = vpack.c.bf16 %v285_v25, %v284_v24  ;;  %v286_v27 = vld [vmem:[#allocation8 + $0x60] sm:$0xff]  ;;  %v287_v28 = vld [vmem:[#allocation8 + $0x68] sm:$0xff]  ;;  %v288_v30 = vld [vmem:[#allocation8 + $0x70] sm:$0xff]  ;;  %p933_p8 = scmp.ne.s32.totalorder %s1243_s6, %s932_s13  ;;  %s1013_s22 = smov [#allocation9]  }
  0x70   : > { %740 = vmatpush3.bf16.msra.mxu0 %v739_v11  ;;  %746 = vmatprep.subr.bf16.mxu1 %v745_v13  ;;  %v765_v29 = vpack.c.bf16 %v287_v28, %v286_v27  ;;  %v289_v31 = vld [vmem:[#allocation8 + $0x78] sm:$0xff]  ;;  %v642_v33 = vld [vmem:[%s1287_s2] ss:$0 sm:$0xff]  ;;  %s936_s29 = sshll.u32 %s1013_s22, 4  ;;  %s937_s29 = int_to_ptr.vmem [resolvable:$false] %s936_s29 }
  0x71   : > { %v769_v32 = vpack.c.bf16 %v289_v31, %v288_v30  ;;  %v648_v48 = vld [vmem:[%s1289_s4] ss:$0 sm:$0xff]  ;;  %p934_p1 = pnand %p933_p8, %p1304_p0  ;;  %s938_s17 = scalar_lea.vmem %s937_s29, 128 }
  0x72   : > { %p939_p7 = scmp.lt.s32.totalorder %s1243_s6, %s937_s29  ;;  %p940_p9 = scmp.lt.s32.totalorder %s938_s17, %s932_s13 }
  0x73   : > { %695 = vmatmul.mubr.msk.f32.vlgmr.msra.gmra.mrb[0].mxu0 %vm298_vm1, %v269_v16  ;;  %748 = vmatpush3.bf16.msra.mxu1 %v745_v13  ;;  %p935_p3 = pneg %p934_p1 }
  0x74   : > { %750 = vmatprep.subr.bf16.mxu1 %v749_v17  ;;  %p941_p12 = por %p940_p9, %p939_p7 }
  0x76   : > { %p942_p2 = pnand %p941_p12, %p935_p3 }
  0x77   : > { %752 = vmatpush3.bf16.msra.mxu1 %v749_v17 }
  0x78   : > { %754 = vmatprep.subr.bf16.mxu1 %v753_v20 }
  0x7b   : > { %756 = vmatpush3.bf16.msra.mxu1 %v753_v20 }
  0x7c   : > { %758 = vmatprep.subr.bf16.mxu1 %v757_v23 }
  0x7f   : > { %760 = vmatpush3.bf16.msra.mxu1 %v757_v23 }
  0x80   : > { %762 = vmatprep.subr.bf16.mxu1 %v761_v26 }
  0x83   : > { %764 = vmatpush3.bf16.msra.mxu1 %v761_v26 }
  0x84   : > { %766 = vmatprep.subr.bf16.mxu1 %v765_v29 }
  0x87   : > { %768 = vmatpush3.bf16.msra.mxu1 %v765_v29 }
  0x88   : > { %770 = vmatprep.subr.bf16.mxu1 %v769_v32 }
  0x8b   : > { %772 = vmatpush3.bf16.msra.mxu1 %v769_v32 }
 0x146   : > { %v368_v34 = vpop.f32.mrb[0].mxu0 }
 0x147   : > { %v369_v35 = vadd.f32 %v642_v33, %v368_v34  ;;  %v696_v36 = vpop.f32.mrb[1].mxu0 }
 0x149   : > { %v372_v37 = vmul.f32 0.5, %v369_v35 }
 0x14b   : > { %vm374_vm2 = vcmp.ge.f32.partialorder %v372_v37, 1.0 }
 0x14c   : > { %v378_v38 = vsel %vm374_vm2, 0.0, %v372_v37  ;;  %729 = vmatprep.mubr.msk.f32.mxu1 %vm374_vm2, %v1012_v39 }
 0x14d   : > { %v379_v40 = vmul.f32 0.5, %v378_v38 }
 0x14f   : > { %v380_v41 = vadd.f32 %v379_v40, %v372_v37 }
 0x151   : > { %vm381_vm3 = vcmp.ge.f32.partialorder %v380_v41, 1.0 }
 0x152   : > { %v385_v42 = vsel %vm381_vm3, 0.0, %v380_v41  ;;  %730 = vmatmul.mubr.msk.f32.vlgmr.msra.gmra.mrb[0].mxu1 %vm381_vm3, %v1012_v39 }
 0x153   : > { %v386_v43 = vmul.f32 0.5, %v385_v42 }
 0x155   : > { %v387_v44 = vadd.f32 %v386_v43, %v372_v37 }
 0x157   : > { %vm388_vm4 = vcmp.ge.f32.partialorder %v387_v44, 1.0 }
 0x158   : > { %v392_v45 = vsel %vm388_vm4, 0.0, %v387_v44  ;;  %732 = vmatprep.mubr.msk.f32.mxu1 %vm388_vm4, %v1012_v39 }
 0x159   : > { %v393_v46 = vmul.f32 0.5, %v392_v45 }
 0x15b   : > { %v394_v47 = vadd.f32 %v393_v46, %v372_v37 }
 0x15d   : > { %vm395_vm5 = vcmp.ge.f32.partialorder %v394_v47, 1.0 }
 0x15e   : > { %733 = vmatmul.mubr.msk.f32.gmra.mrb[2].mxu1 %vm395_vm5, %v1012_v39 }
 0x225   : > { %v731_v49 = vpop.f32.mrb[0].mxu1 }
 0x226   : > { %v475_v50 = vpop.f32.mrb[1].mxu1  ;;  %v481_v52 = vadd.f32 %v731_v49, %v648_v48 }
 0x227   : > { %v476_v51 = vadd.f32 %v648_v48, %v475_v50 }
 0x228   : > { %v495_v55 = vmul.f32 0.5, %v481_v52 }
 0x229   : > { %v494_v53 = vmul.f32 0.5, %v476_v51 }
 0x22b   : > { %vm499_vm6 = vcmp.ge.f32.partialorder %v494_v53, 1.0 }
 0x22c   : > { %v503_v54 = vsel %vm499_vm6, 0.0, %v494_v53  ;;  %v649_v59 = vsel %vm499_vm6, 1.0, %v1011_v1 }
 0x22d   : > { %v504_v56 = vmul.f32 0.5, %v503_v54 }
 0x22f   : > { %v505_v57 = vadd.f32 %v504_v56, %v495_v55 }
 0x231   : > { %vm506_vm7 = vcmp.ge.f32.partialorder %v505_v57, 1.0  ;;  %v734_v58 = vpop.f32.mrb[2].mxu1 }
 0x232   : > { %v650_v60 = vsel %vm506_vm7, 1.0, %v1011_v1  ;;  %v485_v61 = vpop.f32.mrb[3].mxu1  ;;  %v510_v62 = vsel %vm506_vm7, 0.0, %v505_v57  ;;  %v491_v4 = vadd.f32 %v734_v58, %v648_v48 }
 0x233   : > { %v509_v63 = vadd.f32 %v650_v60, %v649_v59  ;;  %v486_v0 = vadd.f32 %v648_v48, %v485_v61  ;;  %v511_v3 = vmul.f32 0.5, %v510_v62 }
 0x234   : > { %v497_v8 = vmul.f32 0.5, %v491_v4 }
 0x235   : > { %v496_v2 = vmul.f32 0.5, %v486_v0 }
 0x237   : > { %v512_v5 = vadd.f32 %v511_v3, %v496_v2 }
 0x239   : > { %vm513_vm8 = vcmp.ge.f32.partialorder %v512_v5, 1.0 }
 0x23a   : > { %v651_v6 = vsel %vm513_vm8, 1.0, %v1011_v1  ;;  %v517_v7 = vsel %vm513_vm8, 0.0, %v512_v5 }
 0x23b   : > { %v516_v9 = vadd.f32 %v651_v6, %v509_v63  ;;  %v518_v10 = vmul.f32 0.5, %v517_v7 }
 0x23d   : > { %v519_v11 = vadd.f32 %v518_v10, %v497_v8 }
 0x23f   : > { %vm520_vm9 = vcmp.ge.f32.partialorder %v519_v11, 1.0 }
 0x240   : > { %v652_v12 = vsel %vm520_vm9, 1.0, %v1011_v1 }
 0x241   : > { %v523_v13 = vadd.f32 %v652_v12, %v516_v9 }
 0x243   : > { %v524_v14 = vmul.f32 0.25, %v523_v13 }
 0x245   : > { %v525_v15 = vpack.c.bf16 %v524_v14, %v524_v14 }
 0x247   : > { %526 = vst [vmem:[%s268_s7] sm:$0xf] %v525_v15 }
 0x248   : > { %945 = shalt.err (!%p942_p2)
}
 0x249   : > { %s946_s12 = scalar_lea.hbm %s1241_s16, 64  ;;  %s950_s8 = scalar_lea.hbm %s1290_s5, 128 }
 0x24a   : > { %p947_p13 = scmp.ne.s32.totalorder %s1241_s16, %s946_s12  ;;  %p951_p4 = scmp.lt.u32.totalorder %s1241_s16, %s1290_s5 }
 0x24b   : > { %p952_p5 = scmp.lt.u32.totalorder %s950_s8, %s946_s12  ;;  %p954_p8 = scmp.lt.u32.totalorder %s946_s12, %s1241_s16 }
 0x24c   : > { %p948_p6 = pnand %p947_p13, %p1304_p0 }
 0x24d   : > { %p953_p11 = por %p952_p5, %p951_p4 }
 0x24e   : > { %p949_p10 = pneg %p948_p6 }
 0x24f   : > { %p955_p1 = por %p954_p8, %p953_p11 }
 0x251   : > { %p956_p3 = pnand %p955_p1, %p949_p10 }
 0x253   : > { %959 = shalt.err (!%p956_p3)
}
 0x254   : > { %783 = dma.vmem_to_hbm [thread:$0]  (%p1304_p0), %s1243_s6, 64, %s1241_s16, %s528_s9  }
 0x255 PF: > { %s553_s28 = sand.u32 1, %s990_s18   ;;  %p1305_p7 = scmp.ne.s32.totalorder %s1295_s25, 0 }
 0x256   : > { %p1306_p9 = scmp.ge.s32.totalorder %s1002_s21, 2  ;;  %s554_s7 = scalar_lea.sflag [#allocation5], %s553_s28 }
 0x258   : > { %p797_p12 = pnand %p1306_p9, %p1305_p7 }
 0x25a   : > { %985 = dma.done.wait (!%p797_p12), %s554_s7, 64  }
 0x25b   : > { %987 = vsyncadd (!%p797_p12), %s554_s7, 4294967232  ;;  %p19_p2 = scmp.ge.s32.totalorder %s1154_s14, 4   ;;  %s1307_s18 = smov %s994_s19 }
 0x25c   : > { %s1308_s19 = smov %s998_s20  ;;  %s1309_s20 = smov %s1170_s27 }
 0x25d   : > { %s1310_s21 = smov %s1154_s14  ;;  %21 = sbr.rel (!%p19_p2) target bundleno = 6 (0x6), region = 93 }
 0x264   :  { %559 = vsyncpa [#allocation4], 1 }
 0x265   :  { %561 = vsyncpa [#allocation4 + $0x1], 1 }
 0x266   :  { %562 = vsyncpa [#allocation7], 1 }
 0x267   :  { %563 = vsyncpa [#allocation5], 1 }
 0x268   :  { %565 = vsyncpa [#allocation5 + $0x1], 1 }

// kernel: tpu_custom_call.1
= control target key start
LH: loop header
LB: loop body
LE: loop exit
PB: predicated region body
PF: predicated region fallthrough
CT: control target
= control target key end

     0   :  { %10 = vsyncpa [#allocation4], 0  ;;  %s1285_s0 = inlined_call_operand.hbm [shape: f32[16,32], index: 0, kind: input, shape index: {}]   ;;  %s1286_s1 = inlined_call_operand.hbm [shape: f32[32,128], index: 1, kind: input, shape index: {}]   ;;  %s1287_s2 = inlined_call_operand.vmem [shape: f32[1,128], index: 2, kind: input, shape index: {}]   ;;  %s1288_s3 = inlined_call_operand.hbm [shape: f32[128,128], index: 3, kind: input, shape index: {}]   ;;  %s1289_s4 = inlined_call_operand.vmem [shape: f32[1,128], index: 4, kind: input, shape index: {}]   ;;  %s1290_s5 = inlined_call_operand.hbm [shape: bf16[16,128], index: 5, kind: output, shape index: {}]  }
   0x1   :  { %12 = vsyncpa [#allocation4 + $0x1], 0 }
   0x2   :  { %13 = vsyncpa [#allocation7], 0 }
   0x3   :  { %14 = vsyncpa [#allocation5], 0 }
   0x4   :  { %16 = vsyncpa [#allocation5 + $0x1], 0  ;;  %s1044_s18 = smov 0   ;;  %s1046_s19 = smov 0  }
   0x5   :  { %s1048_s20 = smov 0   ;;  %s1050_s21 = smov 0  }
   0x6 LB: > { %s1065_s22 = sadd.s32 4294967295, %s1002_s21   ;;  %s630_s23 = sadd.s32 4294967294, %s1002_s21   ;;  %s1002_s21 = sphi %s1050_s21, %s1310_s21   ;;  %s998_s20 = sphi %s1048_s20, %s1309_s20   ;;  %s994_s19 = sphi %s1046_s19, %s1308_s19   ;;  %s990_s18 = sphi %s1044_s18, %s1307_s18  }
   0x7   : > { %p42_p0 = scmp.ne.s32.totalorder %s994_s19, %s990_s18  ;;  %p1291_p1 = scmp.eq.s32.totalorder %s1065_s22, 0 }
   0x8   : > { %p156_p3 = scmp.eq.s32.totalorder %s630_s23, 1  ;;  %p631_p5 = scmp.ge.s32.totalorder %s1002_s21, 1 }
   0x9   : > { %p1074_p4 = por %p1291_p1, %p42_p0  ;;  %p163_p7 = scmp.lt.s32.totalorder %s1002_s21, 3 }
   0xa   : > { %p1079_p6 = por %p156_p3, %p42_p0  ;;  %s1004_s27 = smov [#allocation6]  }
   0xb   : > { %s1294_s24 = scalar_select %p1074_p4, 1, 0 }
   0xc   : > { %s1295_s25 = scalar_select %p1079_p6, 1, 0 }
   0xd   : > { %p1084_p8 = pnand %p631_p5, %p163_p7  ;;  %s175_s28 = sshll.u32 %s1004_s27, 4  ;;  %s1088_s28 = int_to_ptr.vmem [resolvable:$true] %s175_s28 }
   0xe   : > { %s1005_s30 = smov [#allocation8]   ;;  %s846_s9 = scalar_lea.hbm %s1286_s1, 512 }
   0xf   : > { %p785_p9 = pneg %p1084_p8  ;;  %s191_s6 = sshll.u32 %s1005_s30, 4  ;;  %s1099_s6 = int_to_ptr.vmem [resolvable:$true] %s191_s6 }
  0x10   : > { %p847_p12 = scmp.ne.s32.totalorder %s1286_s1, %s846_s9  ;;  %p853_p5 = scmp.lt.u32.totalorder %s846_s9, %s1286_s1 }
  0x11   : > { %p1095_p11 = pnand %p785_p9, %p1291_p1 }
  0x13   : > { %p848_p13 = pneg %p1095_p11 }
  0x15   : > { %p849_p0 = pnand %p848_p13, %p847_p12 }
  0x17   : > { %p850_p3 = pneg %p849_p0 }
  0x19   : > { %p855_p7 = pnand %p853_p5, %p850_p3 }
  0x1b   : > { %858 = shalt.err (!%p855_p7)
}
  0x1c   : > { %s859_s14 = scalar_lea.vmem %s1088_s28, 512  ;;  %p867_p2 = scmp.lt.s32.totalorder %s1088_s28, %s1088_s28 }
  0x1d   : > { %p860_p9 = scmp.ne.s32.totalorder %s1088_s28, %s859_s14  ;;  %p868_p12 = scmp.lt.s32.totalorder %s859_s14, %s859_s14 }
  0x1f   : > { %p862_p10 = pnand %p860_p9, %p848_p13  ;;  %p869_p0 = por %p868_p12, %p867_p2 }
  0x21   : > { %p863_p1 = pneg %p862_p10 }
  0x23   : > { %p870_p6 = pnand %p869_p0, %p863_p1 }
  0x25   : > { %873 = shalt.err (!%p870_p6)
}
  0x26   : > { %s1006_s15 = smov 128   ;;  %s1007_s16 = smov 8  }
  0x27   : > { %788 = dma.hbm_to_vmem [thread:$0]  (!%p1095_p11), %s1286_s1, 512, %s1088_s28, [#allocation7], %s1006_s15, %s1006_s15, %s1007_s16  }
  0x28   : > { %s874_s7 = scalar_lea.hbm %s1288_s3, 2048 }
  0x29   : > { %p875_p2 = scmp.ne.s32.totalorder %s1288_s3, %s874_s7  ;;  %p881_p10 = scmp.lt.u32.totalorder %s874_s7, %s1288_s3 }
  0x2b   : > { %p877_p1 = pnand %p875_p2, %p848_p13 }
  0x2d   : > { %p878_p6 = pneg %p877_p1 }
  0x2f   : > { %p883_p3 = pnand %p881_p10, %p878_p6 }
  0x31   : > { %886 = shalt.err (!%p883_p3)
}
  0x32   : > { %s887_s28 = scalar_lea.vmem %s1099_s6, 2048  ;;  %p895_p12 = scmp.lt.s32.totalorder %s1099_s6, %s1099_s6 }
  0x33   : > { %p888_p5 = scmp.ne.s32.totalorder %s1099_s6, %s887_s28  ;;  %p896_p0 = scmp.lt.s32.totalorder %s887_s28, %s887_s28 }
  0x35   : > { %p890_p7 = pnand %p888_p5, %p848_p13  ;;  %p897_p2 = por %p896_p0, %p895_p12 }
  0x37   : > { %p891_p9 = pneg %p890_p7 }
  0x39   : > { %p898_p1 = pnand %p897_p2, %p891_p9 }
  0x3b   : > { %901 = shalt.err (!%p898_p1)
}
  0x3c   : > { %791 = dma.hbm_to_vmem [thread:$0]  (!%p1095_p11), %s1288_s3, 2048, %s1099_s6, [#allocation7], %s1006_s15, %s1006_s15, %s1007_s16  }
  0x3d   : > { %s1154_s14 = sadd.s32 1, %s1002_s21   ;;  %s29_s29 = sadd.s32 1, %s998_s20 }
  0x3e   : > { %s26_s17 = ssub.s32 %s1002_s21, %s1154_s14  ;;  %p36_p13 = scmp.ne.s32.totalorder %s998_s20, %s994_s19 }
  0x3f   : > { %p27_p6 = scmp.eq.s32.totalorder %s26_s17, 0  ;;  %p37_p10 = scmp.eq.s32.totalorder %s1002_s21, 0 }
  0x40   : > { %p1298_p3 = scmp.eq.s32.totalorder %s1065_s22, 1  ;;  %p802_p7 = scmp.lt.s32.totalorder %s1002_s21, 2 }
  0x41   : > { %s1170_s27 = scalar_select %p27_p6, %s998_s20, %s29_s29  }
  0x42   : > { %p1164_p5 = por %p1298_p3, %p36_p13  ;;  %p38_p9 = por %p37_p10, %p36_p13 }
  0x43   : > { %s208_s30 = sand.u32 1, %s998_s20   ;;  %s636_s6 = sshll.u32 %s1002_s21, 7 }
  0x44   : > { %s1299_s23 = scalar_select %p1164_p5, 1, 0 }
  0x45   : > { %s635_s7 = sshll.u32 %s208_s30, 3  ;;  %s1177_s8 = scalar_lea.hbm %s1285_s0, %s636_s6 }
  0x46   : > { %s212_s9 = scalar_lea.vmem [#allocation3], %s635_s7  ;;  %p1181_p11 = pnand %p802_p7, %p38_p9 }
  0x47   : > { %s219_s10 = sshll.u32 %s212_s9, 4  ;;  %s209_s28 = scalar_lea.sflag [#allocation4], %s208_s30  ;;  %s1179_s10 = int_to_ptr.vmem [resolvable:$true] %s219_s10 }
  0x48   : > { %s902_s12 = scalar_lea.hbm %s1177_s8, 128  ;;  %p904_p0 = pneg %p1181_p11 }
  0x49   : > { %p903_p12 = scmp.ne.s32.totalorder %s1177_s8, %s902_s12  ;;  %s907_s17 = scalar_lea.hbm %s1285_s0, 256 }
  0x4a   : > { %p908_p13 = scmp.lt.u32.totalorder %s1177_s8, %s1285_s0  ;;  %p909_p6 = scmp.lt.u32.totalorder %s907_s17, %s902_s12 }
  0x4b   : > { %p905_p2 = pnand %p904_p0, %p903_p12  ;;  %p911_p3 = scmp.lt.u32.totalorder %s902_s12, %s1177_s8 }
  0x4c   : > { %p910_p10 = por %p909_p6, %p908_p13 }
  0x4d   : > { %p906_p1 = pneg %p905_p2 }
  0x4e   : > { %p912_p7 = por %p911_p3, %p910_p10 }
  0x50   : > { %p913_p9 = pnand %p912_p7, %p906_p1 }
  0x52   : > { %916 = shalt.err (!%p913_p9)
}
  0x53   : > { %s917_s30 = scalar_lea.vmem %s1179_s10, 128  ;;  %s1008_s15 = smov [#allocation3]  }
  0x54   : > { %p918_p12 = scmp.ne.s32.totalorder %s1179_s10, %s917_s30  ;;  %s922_s16 = sshll.u32 %s1008_s15, 4  ;;  %s923_s16 = int_to_ptr.vmem [resolvable:$false] %s922_s16 }
  0x55   : > { %s924_s9 = scalar_lea.vmem %s923_s16, 256  ;;  %p925_p4 = scmp.lt.s32.totalorder %s1179_s10, %s923_s16 }
  0x56   : > { %p920_p2 = pnand %p918_p12, %p904_p0  ;;  %p926_p13 = scmp.lt.s32.totalorder %s924_s9, %s917_s30 }
  0x58   : > { %p921_p5 = pneg %p920_p2  ;;  %p927_p6 = por %p926_p13, %p925_p4 }
  0x5a   : > { %p928_p10 = pnand %p927_p6, %p921_p5 }
  0x5c   : > { %931 = shalt.err (!%p928_p10)
}
  0x5d   : > { %795 = dma.hbm_to_vmem [thread:$0]  (!%p1181_p11), %s1177_s8, 128, %s1179_s10, %s209_s28  }
  0x5e   : > { %228 = sbr.rel (%p1084_p8) target bundleno = 597 (0x255), region = 40  ;;  %s1213_s12 = sand.u32 (!%p1084_p8), 1, %s994_s19  }
  0x5f   : > { %s638_s13 = sshll.u32 (!%p1084_p8), %s1213_s12, 3  ;;  %s231_s29 = scalar_lea.sflag (!%p1084_p8), [#allocation4], %s1213_s12 }
  0x60   : > { %s234_s17 = scalar_lea.vmem (!%p1084_p8), [#allocation3], %s638_s13  ;;  %p1301_p4 = scmp.ne.s32.totalorder (!%p1084_p8), %s1294_s24, 0 }
  0x65   : > { %977 = dma.done.wait (%p1301_p4), %s231_s29, 128  }
  0x66   : > { %979 = vsyncadd (%p1301_p4), %s231_s29, 4294967168  ;;  %p1302_p5 = scmp.eq.s32.totalorder %s1065_s22, 0 }
  0x68   : > { %981 = dma.done.wait (%p1302_p5), [#allocation7], 2560   ;;  %p1303_p11 = pmov %p1302_p5 }
  0x69   : > { %v1009_v0 = vmov 0.0|0.0   ;;  %vm1010_vm0 = vmmov 0   ;;  %v1011_v1 = vmov 0.0   ;;  %v270_v2 = vld [vmem:[#allocation6] sm:$0xff]  ;;  %v271_v3 = vld [vmem:[#allocation6 + $0x8] sm:$0xff]  ;;  %v272_v4 = vld [vmem:[#allocation6 + $0x10] sm:$0xff] }
  0x6a   : > { %983 = vsyncadd (%p1303_p11), [#allocation7], 4294964736  ;;  %735 = vmatprep.subr.bf16.mxu0 %v1009_v0  ;;  %694 = vmatprep.mubr.msk.f32.mxu0 %vm1010_vm0, %v1011_v1  ;;  %v736_v5 = vpack.c.bf16 %v271_v3, %v270_v2  ;;  %v273_v6 = vld [vmem:[#allocation6 + $0x18] sm:$0xff]  ;;  %v274_v7 = vld [vmem:[#allocation8] sm:$0xff]  ;;  %vm298_vm1 = vcmask 261120   ;;  %v1012_v39 = vmov 1.0  }
  0x6b   : > { %v275_v8 = vld [vmem:[#allocation8 + $0x8] sm:$0xff]  ;;  %v276_v9 = vld [vmem:[#allocation8 + $0x10] sm:$0xff]  ;;  %v277_v10 = vld [vmem:[#allocation8 + $0x18] sm:$0xff]  ;;  %v739_v11 = vpack.c.bf16 %v273_v6, %v272_v4  ;;  %s641_s11 = sshll.u32 %s1213_s12, 2  ;;  %s654_s28 = sshll.u32 %s1065_s22, 6 }
  0x6c   : > { %737 = vmatpush3.bf16.msra.mxu0 %v736_v5  ;;  %v741_v12 = vpack.c.bf16 %v275_v8, %v274_v7  ;;  %v745_v13 = vpack.c.bf16 %v277_v10, %v276_v9  ;;  %v278_v14 = vld [vmem:[#allocation8 + $0x20] sm:$0xff]  ;;  %v279_v15 = vld [vmem:[#allocation8 + $0x28] sm:$0xff]  ;;  %v269_v16 = vld [vmem:[%s234_s17] sm:$0xff]  ;;  %s268_s7 = scalar_lea.vmem [#allocation9], %s641_s11  ;;  %s1241_s16 = scalar_lea.hbm %s1290_s5, %s654_s28 }
  0x6d   : > { %738 = vmatprep.subr.bf16.mxu0 %v1009_v0  ;;  %v749_v17 = vpack.c.bf16 %v279_v15, %v278_v14  ;;  %v280_v18 = vld [vmem:[#allocation8 + $0x30] sm:$0xff]  ;;  %v281_v19 = vld [vmem:[#allocation8 + $0x38] sm:$0xff]  ;;  %v282_v21 = vld [vmem:[#allocation8 + $0x40] sm:$0xff]  ;;  %s541_s6 = sshll.u32 %s268_s7, 4  ;;  %s528_s9 = scalar_lea.sflag [#allocation5], %s1213_s12  ;;  %s1243_s6 = int_to_ptr.vmem [resolvable:$true] %s541_s6 }
  0x6e   : > { %742 = vmatprep.subr.bf16.mxu1 %v741_v12  ;;  %v753_v20 = vpack.c.bf16 %v281_v19, %v280_v18  ;;  %v283_v22 = vld [vmem:[#allocation8 + $0x48] sm:$0xff]  ;;  %v284_v24 = vld [vmem:[#allocation8 + $0x50] sm:$0xff]  ;;  %v285_v25 = vld [vmem:[#allocation8 + $0x58] sm:$0xff]  ;;  %s932_s13 = scalar_lea.vmem %s1243_s6, 64  ;;  %p1304_p0 = scmp.ne.s32.totalorder %s1299_s23, 0 }
  0x6f   : > { %744 = vmatpush3.bf16.msra.mxu1 %v741_v12  ;;  %v757_v23 = vpack.c.bf16 %v283_v22, %v282_v21  ;;  %v761_v26 = vpack.c.bf16 %v285_v25, %v284_v24  ;;  %v286_v27 = vld [vmem:[#allocation8 + $0x60] sm:$0xff]  ;;  %v287_v28 = vld [vmem:[#allocation8 + $0x68] sm:$0xff]  ;;  %v288_v30 = vld [vmem:[#allocation8 + $0x70] sm:$0xff]  ;;  %p933_p8 = scmp.ne.s32.totalorder %s1243_s6, %s932_s13  ;;  %s1013_s22 = smov [#allocation9]  }
  0x70   : > { %740 = vmatpush3.bf16.msra.mxu0 %v739_v11  ;;  %746 = vmatprep.subr.bf16.mxu1 %v745_v13  ;;  %v765_v29 = vpack.c.bf16 %v287_v28, %v286_v27  ;;  %v289_v31 = vld [vmem:[#allocation8 + $0x78] sm:$0xff]  ;;  %v642_v33 = vld [vmem:[%s1287_s2] ss:$0 sm:$0xff]  ;;  %s936_s29 = sshll.u32 %s1013_s22, 4  ;;  %s937_s29 = int_to_ptr.vmem [resolvable:$false] %s936_s29 }
  0x71   : > { %v769_v32 = vpack.c.bf16 %v289_v31, %v288_v30  ;;  %v648_v48 = vld [vmem:[%s1289_s4] ss:$0 sm:$0xff]  ;;  %p934_p1 = pnand %p933_p8, %p1304_p0  ;;  %s938_s17 = scalar_lea.vmem %s937_s29, 128 }
  0x72   : > { %p939_p7 = scmp.lt.s32.totalorder %s1243_s6, %s937_s29  ;;  %p940_p9 = scmp.lt.s32.totalorder %s938_s17, %s932_s13 }
  0x73   : > { %695 = vmatmul.mubr.msk.f32.vlgmr.msra.gmra.mrb[0].mxu0 %vm298_vm1, %v269_v16  ;;  %748 = vmatpush3.bf16.msra.mxu1 %v745_v13  ;;  %p935_p3 = pneg %p934_p1 }
  0x74   : > { %750 = vmatprep.subr.bf16.mxu1 %v749_v17  ;;  %p941_p12 = por %p940_p9, %p939_p7 }
  0x76   : > { %p942_p2 = pnand %p941_p12, %p935_p3 }
  0x77   : > { %752 = vmatpush3.bf16.msra.mxu1 %v749_v17 }
  0x78   : > { %754 = vmatprep.subr.bf16.mxu1 %v753_v20 }
  0x7b   : > { %756 = vmatpush3.bf16.msra.mxu1 %v753_v20 }
  0x7c   : > { %758 = vmatprep.subr.bf16.mxu1 %v757_v23 }
  0x7f   : > { %760 = vmatpush3.bf16.msra.mxu1 %v757_v23 }
  0x80   : > { %762 = vmatprep.subr.bf16.mxu1 %v761_v26 }
  0x83   : > { %764 = vmatpush3.bf16.msra.mxu1 %v761_v26 }
  0x84   : > { %766 = vmatprep.subr.bf16.mxu1 %v765_v29 }
  0x87   : > { %768 = vmatpush3.bf16.msra.mxu1 %v765_v29 }
  0x88   : > { %770 = vmatprep.subr.bf16.mxu1 %v769_v32 }
  0x8b   : > { %772 = vmatpush3.bf16.msra.mxu1 %v769_v32 }
 0x146   : > { %v368_v34 = vpop.f32.mrb[0].mxu0 }
 0x147   : > { %v369_v35 = vadd.f32 %v642_v33, %v368_v34  ;;  %v696_v36 = vpop.f32.mrb[1].mxu0 }
 0x149   : > { %v372_v37 = vmul.f32 0.5, %v369_v35 }
 0x14b   : > { %vm374_vm2 = vcmp.ge.f32.partialorder %v372_v37, 1.0 }
 0x14c   : > { %v378_v38 = vsel %vm374_vm2, 0.0, %v372_v37  ;;  %729 = vmatprep.mubr.msk.f32.mxu1 %vm374_vm2, %v1012_v39 }
 0x14d   : > { %v379_v40 = vmul.f32 0.5, %v378_v38 }
 0x14f   : > { %v380_v41 = vadd.f32 %v379_v40, %v372_v37 }
 0x151   : > { %vm381_vm3 = vcmp.ge.f32.partialorder %v380_v41, 1.0 }
 0x152   : > { %v385_v42 = vsel %vm381_vm3, 0.0, %v380_v41  ;;  %730 = vmatmul.mubr.msk.f32.vlgmr.msra.gmra.mrb[0].mxu1 %vm381_vm3, %v1012_v39 }
 0x153   : > { %v386_v43 = vmul.f32 0.5, %v385_v42 }
 0x155   : > { %v387_v44 = vadd.f32 %v386_v43, %v372_v37 }
 0x157   : > { %vm388_vm4 = vcmp.ge.f32.partialorder %v387_v44, 1.0 }
 0x158   : > { %v392_v45 = vsel %vm388_vm4, 0.0, %v387_v44  ;;  %732 = vmatprep.mubr.msk.f32.mxu1 %vm388_vm4, %v1012_v39 }
 0x159   : > { %v393_v46 = vmul.f32 0.5, %v392_v45 }
 0x15b   : > { %v394_v47 = vadd.f32 %v393_v46, %v372_v37 }
 0x15d   : > { %vm395_vm5 = vcmp.ge.f32.partialorder %v394_v47, 1.0 }
 0x15e   : > { %733 = vmatmul.mubr.msk.f32.gmra.mrb[2].mxu1 %vm395_vm5, %v1012_v39 }
 0x225   : > { %v731_v49 = vpop.f32.mrb[0].mxu1 }
 0x226   : > { %v475_v50 = vpop.f32.mrb[1].mxu1  ;;  %v481_v52 = vadd.f32 %v731_v49, %v648_v48 }
 0x227   : > { %v476_v51 = vadd.f32 %v648_v48, %v475_v50 }
 0x228   : > { %v495_v55 = vmul.f32 0.5, %v481_v52 }
 0x229   : > { %v494_v53 = vmul.f32 0.5, %v476_v51 }
 0x22b   : > { %vm499_vm6 = vcmp.ge.f32.partialorder %v494_v53, 1.0 }
 0x22c   : > { %v503_v54 = vsel %vm499_vm6, 0.0, %v494_v53  ;;  %v649_v59 = vsel %vm499_vm6, 1.0, %v1011_v1 }
 0x22d   : > { %v504_v56 = vmul.f32 0.5, %v503_v54 }
 0x22f   : > { %v505_v57 = vadd.f32 %v504_v56, %v495_v55 }
 0x231   : > { %vm506_vm7 = vcmp.ge.f32.partialorder %v505_v57, 1.0  ;;  %v734_v58 = vpop.f32.mrb[2].mxu1 }
 0x232   : > { %v650_v60 = vsel %vm506_vm7, 1.0, %v1011_v1  ;;  %v485_v61 = vpop.f32.mrb[3].mxu1  ;;  %v510_v62 = vsel %vm506_vm7, 0.0, %v505_v57  ;;  %v491_v4 = vadd.f32 %v734_v58, %v648_v48 }
 0x233   : > { %v509_v63 = vadd.f32 %v650_v60, %v649_v59  ;;  %v486_v0 = vadd.f32 %v648_v48, %v485_v61  ;;  %v511_v3 = vmul.f32 0.5, %v510_v62 }
 0x234   : > { %v497_v8 = vmul.f32 0.5, %v491_v4 }
 0x235   : > { %v496_v2 = vmul.f32 0.5, %v486_v0 }
 0x237   : > { %v512_v5 = vadd.f32 %v511_v3, %v496_v2 }
 0x239   : > { %vm513_vm8 = vcmp.ge.f32.partialorder %v512_v5, 1.0 }
 0x23a   : > { %v651_v6 = vsel %vm513_vm8, 1.0, %v1011_v1  ;;  %v517_v7 = vsel %vm513_vm8, 0.0, %v512_v5 }
 0x23b   : > { %v516_v9 = vadd.f32 %v651_v6, %v509_v63  ;;  %v518_v10 = vmul.f32 0.5, %v517_v7 }
 0x23d   : > { %v519_v11 = vadd.f32 %v518_v10, %v497_v8 }
 0x23f   : > { %vm520_vm9 = vcmp.ge.f32.partialorder %v519_v11, 1.0 }
 0x240   : > { %v652_v12 = vsel %vm520_vm9, 1.0, %v1011_v1 }
 0x241   : > { %v523_v13 = vadd.f32 %v652_v12, %v516_v9 }
 0x243   : > { %v524_v14 = vmul.f32 0.25, %v523_v13 }
 0x245   : > { %v525_v15 = vpack.c.bf16 %v524_v14, %v524_v14 }
 0x247   : > { %526 = vst [vmem:[%s268_s7] sm:$0xf] %v525_v15 }
 0x248   : > { %945 = shalt.err (!%p942_p2)
}
 0x249   : > { %s946_s12 = scalar_lea.hbm %s1241_s16, 64  ;;  %s950_s8 = scalar_lea.hbm %s1290_s5, 128 }
 0x24a   : > { %p947_p13 = scmp.ne.s32.totalorder %s1241_s16, %s946_s12  ;;  %p951_p4 = scmp.lt.u32.totalorder %s1241_s16, %s1290_s5 }
 0x24b   : > { %p952_p5 = scmp.lt.u32.totalorder %s950_s8, %s946_s12  ;;  %p954_p8 = scmp.lt.u32.totalorder %s946_s12, %s1241_s16 }
 0x24c   : > { %p948_p6 = pnand %p947_p13, %p1304_p0 }
 0x24d   : > { %p953_p11 = por %p952_p5, %p951_p4 }
 0x24e   : > { %p949_p10 = pneg %p948_p6 }
 0x24f   : > { %p955_p1 = por %p954_p8, %p953_p11 }
 0x251   : > { %p956_p3 = pnand %p955_p1, %p949_p10 }
 0x253   : > { %959 = shalt.err (!%p956_p3)
}
 0x254   : > { %783 = dma.vmem_to_hbm [thread:$0]  (%p1304_p0), %s1243_s6, 64, %s1241_s16, %s528_s9  }
 0x255 PF: > { %s553_s28 = sand.u32 1, %s990_s18   ;;  %p1305_p7 = scmp.ne.s32.totalorder %s1295_s25, 0 }
 0x256   : > { %p1306_p9 = scmp.ge.s32.totalorder %s1002_s21, 2  ;;  %s554_s7 = scalar_lea.sflag [#allocation5], %s553_s28 }
 0x258   : > { %p797_p12 = pnand %p1306_p9, %p1305_p7 }
 0x25a   : > { %985 = dma.done.wait (!%p797_p12), %s554_s7, 64  }
 0x25b   : > { %987 = vsyncadd (!%p797_p12), %s554_s7, 4294967232  ;;  %p19_p2 = scmp.ge.s32.totalorder %s1154_s14, 4   ;;  %s1307_s18 = smov %s994_s19 }
 0x25c   : > { %s1308_s19 = smov %s998_s20  ;;  %s1309_s20 = smov %s1170_s27 }
 0x25d   : > { %s1310_s21 = smov %s1154_s14  ;;  %21 = sbr.rel (!%p19_p2) target bundleno = 6 (0x6), region = 93 }
 0x264   :  { %559 = vsyncpa [#allocation4], 1 }
 0x265   :  { %561 = vsyncpa [#allocation4 + $0x1], 1 }
 0x266   :  { %562 = vsyncpa [#allocation7], 1 }
 0x267   :  { %563 = vsyncpa [#allocation5], 1 }
 0x268   :  { %565 = vsyncpa [#allocation5 + $0x1], 1 }

</bundles_post_ra>
